<compile_context>
chip_gen: v5e
topology: v5e:2x2
jax: 0.10.0
libtpu: 0.0.40
codegen_flags: <defaults>
</compile_context>

<pallas_src>
import functools

import jax
import jax.numpy as jnp
import numpy as np
from jax.experimental import pallas as pl
from jax.experimental.pallas import tpu as pltpu


def _round_up(n, m):
    return ((n + m - 1) // m) * m


def _lstm_wavefront_kernel(L, T, B_pad, H, I_pad, LH_pad,
                           x_ref, slab_ref, out_ref):
    """Multi-layer LSTM encoder, wavefront-overlapped, one invocation.

    x_ref    : (T * B_pad, I_pad)            time-major, batch-padded input
    slab_ref : (I_pad + LH_pad + B_pad, G)   packed weights / biases, G = 4*L*H
                 rows [0, I_pad)                 -> W_ih layer 0 (gate-interleaved cols)
                 rows [I_pad, I_pad + LH)        -> block W (W_hh_l + W_ih_{l+1})
                 rows [I_pad + LH_pad, ... + 8)  -> fused biases replicated per row
    out_ref  : (B_pad, 2 * L * H)            [ h_cat | c_cat ]
    """
    LH = L * H
    G = 4 * LH

    # ---- one-time loads (hoisted off the recurrent chain) -------------------
    w_ih0 = slab_ref[0:I_pad, :]                                     # (I_pad, G)
    w_big = slab_ref[I_pad:I_pad + LH, :]                            # (LH, G)
    bias_blk = slab_ref[I_pad + LH_pad:I_pad + LH_pad + B_pad, :]    # (B_pad, G)

    # ---- off the critical path: layer-0 input projection for ALL T steps ----
    precomp = jnp.dot(x_ref[...], w_ih0,
                      preferred_element_type=jnp.float32)            # (T*B_pad, G)
    precomp = precomp.reshape(T, B_pad, G)

    # Lane index (for edge-step activity masks); layer l owns cols [l*H,(l+1)*H).
    col_idx = jax.lax.broadcasted_iota(jnp.int32, (B_pad, LH), 1)

    h_cat = jnp.zeros((B_pad, LH), jnp.float32)
    c_cat = jnp.zeros((B_pad, LH), jnp.float32)

    # ---- wavefront recurrence: T + L - 1 serial steps, fully unrolled -------
    for s in range(T + L - 1):
        add = bias_blk if s >= T else bias_blk + precomp[s]
        gates = add + jnp.dot(h_cat, w_big,
                              preferred_element_type=jnp.float32)    # (B_pad, G)

        # Two full-width EUP passes per wavefront step (all layers at once).
        sig = jax.nn.sigmoid(gates)
        th = jnp.tanh(gates)

        # Gate-interleaved layout: [ i(all layers) | f | g | o ].
        i_cat = sig[:, 0 * LH:1 * LH]
        f_cat = sig[:, 1 * LH:2 * LH]
        g_cat = th[:, 2 * LH:3 * LH]
        o_cat = sig[:, 3 * LH:4 * LH]

        c_new = f_cat * c_cat + i_cat * g_cat
        h_new = o_cat * jnp.tanh(c_new)

        # Layer l is active at wavefront step s iff l <= s <= l + T - 1.
        lo = max(0, s - T + 1)          # first active layer (static)
        hi = min(L - 1, s)              # last active layer (static)
        if lo == 0 and hi == L - 1:     # interior step: every layer active
            c_cat, h_cat = c_new, h_new
        else:                            # edge step: mask inactive layer cols
            active = jnp.logical_and(col_idx >= lo * H, col_idx < (hi + 1) * H)
            c_cat = jnp.where(active, c_new, c_cat)
            h_cat = jnp.where(active, h_new, h_cat)

    # Single lane-dense output store: [ h_cat | c_cat ].
    out_ref[...] = jnp.concatenate([h_cat, c_cat], axis=1)


def _build_packed_weights(params, L, H, I, I_pad, LH_pad, B_pad):
    """Pack all per-layer weights/biases into one (rows, 4*L*H) f32 slab."""
    LH = L * H
    G = 4 * LH

    def place(w4h, l):
        # w4h: (rows, 4H), PyTorch gate order [i|f|g|o] along columns.
        # Scatter into the gate-interleaved layout: gate k of layer l lands at
        # columns [k*LH + l*H, k*LH + (l+1)*H).
        out = jnp.zeros((w4h.shape[0], G), jnp.float32)
        for k in range(4):
            out = out.at[:, k * LH + l * H:k * LH + (l + 1) * H].set(
                w4h[:, k * H:(k + 1) * H])
        return out

    # Layer-0 input-projection weights (zero in other layers' columns).
    w_ih0 = jnp.transpose(params["w_ih"][0]).astype(jnp.float32)        # (I, 4H)
    w_ih0_big = jnp.pad(place(w_ih0, 0), ((0, I_pad - I), (0, 0)))       # (I_pad, G)

    # Block recurrent + inter-layer weights:
    #   rows l*H:(l+1)*H  x  layer-l cols     <- W_hh_l
    #   rows l*H:(l+1)*H  x  layer-(l+1) cols <- W_ih_{l+1}
    w_big = jnp.zeros((LH, G), jnp.float32)
    for l in range(L):
        w_hh = jnp.transpose(params["w_hh"][l]).astype(jnp.float32)      # (H, 4H)
        w_big = w_big.at[l * H:(l + 1) * H, :].add(place(w_hh, l))
        if l + 1 < L:
            w_ih_next = jnp.transpose(params["w_ih"][l + 1]).astype(jnp.float32)
            w_big = w_big.at[l * H:(l + 1) * H, :].add(place(w_ih_next, l + 1))
    w_big = jnp.pad(w_big, ((0, LH_pad - LH), (0, 0)))                   # (LH_pad, G)

    # Fused biases, replicated over the padded batch rows (no in-kernel bcast).
    b_big = jnp.zeros((1, G), jnp.float32)
    for l in range(L):
        b = (params["b_ih"][l] + params["b_hh"][l]).astype(jnp.float32)
        b_big = b_big + place(b.reshape(1, 4 * H), l)
    bias_blk = jnp.tile(b_big, (B_pad, 1))                               # (B_pad, G)

    return jnp.concatenate([w_ih0_big, w_big, bias_blk], axis=0)


def shallow_regression_lstm_encode(x, params, num_layers, hidden_units):
    """x: (batch, seq, num_sensors) float32.  Returns (hn, cn): (L, B, H) each."""
    B, T, I = x.shape
    H = hidden_units
    L = num_layers
    LH = L * H

    B_pad = _round_up(max(B, 1), 8)     # f32 sublane tile
    I_pad = _round_up(I, 8)
    LH_pad = _round_up(LH, 8)

    # Host-side layout plumbing only (no compute hoisting):
    # time-major + batch/feature padded input, one packed weight slab.
    x_tm = jnp.transpose(x, (1, 0, 2)).astype(jnp.float32)               # (T, B, I)
    x_tm = jnp.pad(x_tm, ((0, 0), (0, B_pad - B), (0, I_pad - I)))
    x_flat = x_tm.reshape(T * B_pad, I_pad)

    slab = _build_packed_weights(params, L, H, I, I_pad, LH_pad, B_pad)

    kernel = functools.partial(_lstm_wavefront_kernel, L, T, B_pad, H, I_pad, LH_pad)
    vmem = pl.BlockSpec(memory_space=pltpu.MemorySpace.VMEM)

    hc = pl.pallas_call(
        kernel,
        out_shape=jax.ShapeDtypeStruct((B_pad, 2 * LH), jnp.float32),
        in_specs=[vmem, vmem],
        out_specs=vmem,
    )(x_flat, slab)

    # Wrapper-side unpacking: drop batch padding, split h/c, (B, L*H) -> (L, B, H).
    hn = hc[:B, :LH].reshape(B, L, H).transpose(1, 0, 2)
    cn = hc[:B, LH:].reshape(B, L, H).transpose(1, 0, 2)
    return hn, cn


def _lstm_reference(x, params, num_layers, hidden_units):
    """Pure-JAX reference matching torch.nn.LSTM(batch_first=True) semantics."""
    B, T, _ = x.shape
    H = hidden_units
    hn_list, cn_list = [], []
    layer_in = x
    for l in range(num_layers):
        w_ih = params["w_ih"][l]
        w_hh = params["w_hh"][l]
        b = params["b_ih"][l] + params["b_hh"][l]
        h = jnp.zeros((B, H), jnp.float32)
        c = jnp.zeros((B, H), jnp.float32)
        outs = []
        for t in range(T):
            x_t = layer_in[:, t, :]
            g = x_t @ w_ih.T + h @ w_hh.T + b
            i_g = jax.nn.sigmoid(g[:, 0 * H:1 * H])
            f_g = jax.nn.sigmoid(g[:, 1 * H:2 * H])
            g_g = jnp.tanh(g[:, 2 * H:3 * H])
            o_g = jax.nn.sigmoid(g[:, 3 * H:4 * H])
            c = f_g * c + i_g * g_g
            h = o_g * jnp.tanh(c)
            outs.append(h)
        layer_in = jnp.stack(outs, axis=1)
        hn_list.append(h)
        cn_list.append(c)
    return jnp.stack(hn_list), jnp.stack(cn_list)


def make_params(key, num_sensors, hidden_units, num_layers):
    """Deterministic PyTorch-style init: U(-1/sqrt(H), 1/sqrt(H))."""
    H = hidden_units
    k = 1.0 / np.sqrt(H)
    params = {"w_ih": [], "w_hh": [], "b_ih": [], "b_hh": []}
    for l in range(num_layers):
        in_dim = num_sensors if l == 0 else H
        key, k1, k2, k3, k4 = jax.random.split(key, 5)
        params["w_ih"].append(jax.random.uniform(k1, (4 * H, in_dim), jnp.float32, -k, k))
        params["w_hh"].append(jax.random.uniform(k2, (4 * H, H), jnp.float32, -k, k))
        params["b_ih"].append(jax.random.uniform(k3, (4 * H,), jnp.float32, -k, k))
        params["b_hh"].append(jax.random.uniform(k4, (4 * H,), jnp.float32, -k, k))
    return params


if __name__ == "__main__":
    # Small shapes consistent with the module's forward().
    batch = 2
    seq = 8
    num_sensors = 4
    hidden_units = 32
    num_layers = 2
    # mlp_units is stored by __init__ but never used in forward() — no kernel needed.

    key = jax.random.PRNGKey(0)
    key, xk = jax.random.split(key)
    x = jax.random.normal(xk, (batch, seq, num_sensors), jnp.float32)

    params = make_params(key, num_sensors, hidden_units, num_layers)

    hn, cn = shallow_regression_lstm_encode(x, params, num_layers, hidden_units)
    hn, cn = jax.block_until_ready((hn, cn))

    hn_ref, cn_ref = _lstm_reference(x, params, num_layers, hidden_units)
    np.testing.assert_allclose(np.asarray(hn), np.asarray(hn_ref), rtol=1e-5, atol=1e-5)
    np.testing.assert_allclose(np.asarray(cn), np.asarray(cn_ref), rtol=1e-5, atol=1e-5)

    assert hn.shape == (num_layers, batch, hidden_units)
    assert cn.shape == (num_layers, batch, hidden_units)

    print("KERNEL_OK")
</pallas_src>

<mosaic_0001>
module attributes {stable_mosaic.version = 11 : i64} {
  func.func @_lstm_wavefront_kernel(%arg0: memref<64x8xf32, #tpu.memory_space<vmem>>, %arg1: memref<80x256xf32, #tpu.memory_space<vmem>>, %arg2: memref<8x128xf32, #tpu.memory_space<vmem>>) attributes {dimension_semantics = [], scalar_prefetch = 0 : i64, scratch_operands = 0 : i64, tpu.core_type = #tpu.core_type<tc>} {
    %c0 = arith.constant 0 : index
    %c0_0 = arith.constant 0 : index
    %0 = vector.load %arg1[%c0, %c0_0] : memref<80x256xf32, #tpu.memory_space<vmem>>, vector<8x256xf32>
    %c8 = arith.constant 8 : index
    %c0_1 = arith.constant 0 : index
    %1 = vector.load %arg1[%c8, %c0_1] : memref<80x256xf32, #tpu.memory_space<vmem>>, vector<64x256xf32>
    %c72 = arith.constant 72 : index
    %c0_2 = arith.constant 0 : index
    %2 = vector.load %arg1[%c72, %c0_2] : memref<80x256xf32, #tpu.memory_space<vmem>>, vector<8x256xf32>
    %c0_3 = arith.constant 0 : index
    %c0_4 = arith.constant 0 : index
    %3 = vector.load %arg0[%c0_3, %c0_4] : memref<64x8xf32, #tpu.memory_space<vmem>>, vector<64x8xf32>
    %cst = arith.constant dense<0.000000e+00> : vector<64x256xf32>
    %4 = tpu.matmul %3, %0, %cst {dimension_numbers = #tpu.dot_dimension_numbers<[1], [0], [0], [1], [0, 0, 1, 1], [], []>} : vector<64x8xf32>, vector<8x256xf32>, vector<64x256xf32> -> vector<64x256xf32>
    %5 = vector.shape_cast %4 : vector<64x256xf32> to vector<8x8x256xf32>
    %6 = tpu.iota {dimensions = array<i32: 1>} : vector<8x64xi32>
    %cst_5 = arith.constant 0.000000e+00 : f32
    %7 = vector.broadcast %cst_5 : f32 to vector<8x64xf32>
    %cst_6 = arith.constant 0.000000e+00 : f32
    %8 = vector.broadcast %cst_6 : f32 to vector<8x64xf32>
    %9 = vector.extract_strided_slice %5 {offsets = [0, 0, 0], sizes = [1, 8, 256], strides = [1, 1, 1]} : vector<8x8x256xf32> to vector<1x8x256xf32>
    %10 = vector.shape_cast %9 : vector<1x8x256xf32> to vector<8x256xf32>
    %11 = arith.addf %2, %10 : vector<8x256xf32>
    %cst_7 = arith.constant dense<0.000000e+00> : vector<8x256xf32>
    %12 = tpu.matmul %7, %1, %cst_7 {dimension_numbers = #tpu.dot_dimension_numbers<[1], [0], [0], [1], [0, 0, 1, 1], [], []>} : vector<8x64xf32>, vector<64x256xf32>, vector<8x256xf32> -> vector<8x256xf32>
    %13 = arith.addf %11, %12 : vector<8x256xf32>
    %14 = arith.negf %13 : vector<8x256xf32>
    %15 = math.exp %14 : vector<8x256xf32>
    %cst_8 = arith.constant 1.000000e+00 : f32
    %16 = vector.broadcast %cst_8 : f32 to vector<8x256xf32>
    %17 = arith.addf %16, %15 : vector<8x256xf32>
    %18 = arith.divf %16, %17 : vector<8x256xf32>
    %19 = math.tanh %13 : vector<8x256xf32>
    %20 = vector.extract_strided_slice %18 {offsets = [0, 0], sizes = [8, 64], strides = [1, 1]} : vector<8x256xf32> to vector<8x64xf32>
    %21 = vector.extract_strided_slice %18 {offsets = [0, 64], sizes = [8, 64], strides = [1, 1]} : vector<8x256xf32> to vector<8x64xf32>
    %22 = vector.extract_strided_slice %19 {offsets = [0, 128], sizes = [8, 64], strides = [1, 1]} : vector<8x256xf32> to vector<8x64xf32>
    %23 = vector.extract_strided_slice %18 {offsets = [0, 192], sizes = [8, 64], strides = [1, 1]} : vector<8x256xf32> to vector<8x64xf32>
    %24 = arith.mulf %21, %8 : vector<8x64xf32>
    %25 = arith.mulf %20, %22 : vector<8x64xf32>
    %26 = arith.addf %24, %25 : vector<8x64xf32>
    %27 = math.tanh %26 : vector<8x64xf32>
    %28 = arith.mulf %23, %27 : vector<8x64xf32>
    %c0_i32 = arith.constant 0 : i32
    %29 = vector.broadcast %c0_i32 : i32 to vector<8x64xi32>
    %30 = arith.cmpi sge, %6, %29 : vector<8x64xi32>
    %c32_i32 = arith.constant 32 : i32
    %31 = vector.broadcast %c32_i32 : i32 to vector<8x64xi32>
    %32 = arith.cmpi slt, %6, %31 : vector<8x64xi32>
    %33 = arith.andi %30, %32 : vector<8x64xi1>
    %34 = arith.select %33, %26, %8 : vector<8x64xi1>, vector<8x64xf32>
    %35 = arith.select %33, %28, %7 : vector<8x64xi1>, vector<8x64xf32>
    %36 = vector.extract_strided_slice %5 {offsets = [1, 0, 0], sizes = [1, 8, 256], strides = [1, 1, 1]} : vector<8x8x256xf32> to vector<1x8x256xf32>
    %37 = vector.shape_cast %36 : vector<1x8x256xf32> to vector<8x256xf32>
    %38 = arith.addf %2, %37 : vector<8x256xf32>
    %cst_9 = arith.constant dense<0.000000e+00> : vector<8x256xf32>
    %39 = tpu.matmul %35, %1, %cst_9 {dimension_numbers = #tpu.dot_dimension_numbers<[1], [0], [0], [1], [0, 0, 1, 1], [], []>} : vector<8x64xf32>, vector<64x256xf32>, vector<8x256xf32> -> vector<8x256xf32>
    %40 = arith.addf %38, %39 : vector<8x256xf32>
    %41 = arith.negf %40 : vector<8x256xf32>
    %42 = math.exp %41 : vector<8x256xf32>
    %cst_10 = arith.constant 1.000000e+00 : f32
    %43 = vector.broadcast %cst_10 : f32 to vector<8x256xf32>
    %44 = arith.addf %43, %42 : vector<8x256xf32>
    %45 = arith.divf %43, %44 : vector<8x256xf32>
    %46 = math.tanh %40 : vector<8x256xf32>
    %47 = vector.extract_strided_slice %45 {offsets = [0, 0], sizes = [8, 64], strides = [1, 1]} : vector<8x256xf32> to vector<8x64xf32>
    %48 = vector.extract_strided_slice %45 {offsets = [0, 64], sizes = [8, 64], strides = [1, 1]} : vector<8x256xf32> to vector<8x64xf32>
    %49 = vector.extract_strided_slice %46 {offsets = [0, 128], sizes = [8, 64], strides = [1, 1]} : vector<8x256xf32> to vector<8x64xf32>
    %50 = vector.extract_strided_slice %45 {offsets = [0, 192], sizes = [8, 64], strides = [1, 1]} : vector<8x256xf32> to vector<8x64xf32>
    %51 = arith.mulf %48, %34 : vector<8x64xf32>
    %52 = arith.mulf %47, %49 : vector<8x64xf32>
    %53 = arith.addf %51, %52 : vector<8x64xf32>
    %54 = math.tanh %53 : vector<8x64xf32>
    %55 = arith.mulf %50, %54 : vector<8x64xf32>
    %56 = vector.extract_strided_slice %5 {offsets = [2, 0, 0], sizes = [1, 8, 256], strides = [1, 1, 1]} : vector<8x8x256xf32> to vector<1x8x256xf32>
    %57 = vector.shape_cast %56 : vector<1x8x256xf32> to vector<8x256xf32>
    %58 = arith.addf %2, %57 : vector<8x256xf32>
    %cst_11 = arith.constant dense<0.000000e+00> : vector<8x256xf32>
    %59 = tpu.matmul %55, %1, %cst_11 {dimension_numbers = #tpu.dot_dimension_numbers<[1], [0], [0], [1], [0, 0, 1, 1], [], []>} : vector<8x64xf32>, vector<64x256xf32>, vector<8x256xf32> -> vector<8x256xf32>
    %60 = arith.addf %58, %59 : vector<8x256xf32>
    %61 = arith.negf %60 : vector<8x256xf32>
    %62 = math.exp %61 : vector<8x256xf32>
    %cst_12 = arith.constant 1.000000e+00 : f32
    %63 = vector.broadcast %cst_12 : f32 to vector<8x256xf32>
    %64 = arith.addf %63, %62 : vector<8x256xf32>
    %65 = arith.divf %63, %64 : vector<8x256xf32>
    %66 = math.tanh %60 : vector<8x256xf32>
    %67 = vector.extract_strided_slice %65 {offsets = [0, 0], sizes = [8, 64], strides = [1, 1]} : vector<8x256xf32> to vector<8x64xf32>
    %68 = vector.extract_strided_slice %65 {offsets = [0, 64], sizes = [8, 64], strides = [1, 1]} : vector<8x256xf32> to vector<8x64xf32>
    %69 = vector.extract_strided_slice %66 {offsets = [0, 128], sizes = [8, 64], strides = [1, 1]} : vector<8x256xf32> to vector<8x64xf32>
    %70 = vector.extract_strided_slice %65 {offsets = [0, 192], sizes = [8, 64], strides = [1, 1]} : vector<8x256xf32> to vector<8x64xf32>
    %71 = arith.mulf %68, %53 : vector<8x64xf32>
    %72 = arith.mulf %67, %69 : vector<8x64xf32>
    %73 = arith.addf %71, %72 : vector<8x64xf32>
    %74 = math.tanh %73 : vector<8x64xf32>
    %75 = arith.mulf %70, %74 : vector<8x64xf32>
    %76 = vector.extract_strided_slice %5 {offsets = [3, 0, 0], sizes = [1, 8, 256], strides = [1, 1, 1]} : vector<8x8x256xf32> to vector<1x8x256xf32>
    %77 = vector.shape_cast %76 : vector<1x8x256xf32> to vector<8x256xf32>
    %78 = arith.addf %2, %77 : vector<8x256xf32>
    %cst_13 = arith.constant dense<0.000000e+00> : vector<8x256xf32>
    %79 = tpu.matmul %75, %1, %cst_13 {dimension_numbers = #tpu.dot_dimension_numbers<[1], [0], [0], [1], [0, 0, 1, 1], [], []>} : vector<8x64xf32>, vector<64x256xf32>, vector<8x256xf32> -> vector<8x256xf32>
    %80 = arith.addf %78, %79 : vector<8x256xf32>
    %81 = arith.negf %80 : vector<8x256xf32>
    %82 = math.exp %81 : vector<8x256xf32>
    %cst_14 = arith.constant 1.000000e+00 : f32
    %83 = vector.broadcast %cst_14 : f32 to vector<8x256xf32>
    %84 = arith.addf %83, %82 : vector<8x256xf32>
    %85 = arith.divf %83, %84 : vector<8x256xf32>
    %86 = math.tanh %80 : vector<8x256xf32>
    %87 = vector.extract_strided_slice %85 {offsets = [0, 0], sizes = [8, 64], strides = [1, 1]} : vector<8x256xf32> to vector<8x64xf32>
    %88 = vector.extract_strided_slice %85 {offsets = [0, 64], sizes = [8, 64], strides = [1, 1]} : vector<8x256xf32> to vector<8x64xf32>
    %89 = vector.extract_strided_slice %86 {offsets = [0, 128], sizes = [8, 64], strides = [1, 1]} : vector<8x256xf32> to vector<8x64xf32>
    %90 = vector.extract_strided_slice %85 {offsets = [0, 192], sizes = [8, 64], strides = [1, 1]} : vector<8x256xf32> to vector<8x64xf32>
    %91 = arith.mulf %88, %73 : vector<8x64xf32>
    %92 = arith.mulf %87, %89 : vector<8x64xf32>
    %93 = arith.addf %91, %92 : vector<8x64xf32>
    %94 = math.tanh %93 : vector<8x64xf32>
    %95 = arith.mulf %90, %94 : vector<8x64xf32>
    %96 = vector.extract_strided_slice %5 {offsets = [4, 0, 0], sizes = [1, 8, 256], strides = [1, 1, 1]} : vector<8x8x256xf32> to vector<1x8x256xf32>
    %97 = vector.shape_cast %96 : vector<1x8x256xf32> to vector<8x256xf32>
    %98 = arith.addf %2, %97 : vector<8x256xf32>
    %cst_15 = arith.constant dense<0.000000e+00> : vector<8x256xf32>
    %99 = tpu.matmul %95, %1, %cst_15 {dimension_numbers = #tpu.dot_dimension_numbers<[1], [0], [0], [1], [0, 0, 1, 1], [], []>} : vector<8x64xf32>, vector<64x256xf32>, vector<8x256xf32> -> vector<8x256xf32>
    %100 = arith.addf %98, %99 : vector<8x256xf32>
    %101 = arith.negf %100 : vector<8x256xf32>
    %102 = math.exp %101 : vector<8x256xf32>
    %cst_16 = arith.constant 1.000000e+00 : f32
    %103 = vector.broadcast %cst_16 : f32 to vector<8x256xf32>
    %104 = arith.addf %103, %102 : vector<8x256xf32>
    %105 = arith.divf %103, %104 : vector<8x256xf32>
    %106 = math.tanh %100 : vector<8x256xf32>
    %107 = vector.extract_strided_slice %105 {offsets = [0, 0], sizes = [8, 64], strides = [1, 1]} : vector<8x256xf32> to vector<8x64xf32>
    %108 = vector.extract_strided_slice %105 {offsets = [0, 64], sizes = [8, 64], strides = [1, 1]} : vector<8x256xf32> to vector<8x64xf32>
    %109 = vector.extract_strided_slice %106 {offsets = [0, 128], sizes = [8, 64], strides = [1, 1]} : vector<8x256xf32> to vector<8x64xf32>
    %110 = vector.extract_strided_slice %105 {offsets = [0, 192], sizes = [8, 64], strides = [1, 1]} : vector<8x256xf32> to vector<8x64xf32>
    %111 = arith.mulf %108, %93 : vector<8x64xf32>
    %112 = arith.mulf %107, %109 : vector<8x64xf32>
    %113 = arith.addf %111, %112 : vector<8x64xf32>
    %114 = math.tanh %113 : vector<8x64xf32>
    %115 = arith.mulf %110, %114 : vector<8x64xf32>
    %116 = vector.extract_strided_slice %5 {offsets = [5, 0, 0], sizes = [1, 8, 256], strides = [1, 1, 1]} : vector<8x8x256xf32> to vector<1x8x256xf32>
    %117 = vector.shape_cast %116 : vector<1x8x256xf32> to vector<8x256xf32>
    %118 = arith.addf %2, %117 : vector<8x256xf32>
    %cst_17 = arith.constant dense<0.000000e+00> : vector<8x256xf32>
    %119 = tpu.matmul %115, %1, %cst_17 {dimension_numbers = #tpu.dot_dimension_numbers<[1], [0], [0], [1], [0, 0, 1, 1], [], []>} : vector<8x64xf32>, vector<64x256xf32>, vector<8x256xf32> -> vector<8x256xf32>
    %120 = arith.addf %118, %119 : vector<8x256xf32>
    %121 = arith.negf %120 : vector<8x256xf32>
    %122 = math.exp %121 : vector<8x256xf32>
    %cst_18 = arith.constant 1.000000e+00 : f32
    %123 = vector.broadcast %cst_18 : f32 to vector<8x256xf32>
    %124 = arith.addf %123, %122 : vector<8x256xf32>
    %125 = arith.divf %123, %124 : vector<8x256xf32>
    %126 = math.tanh %120 : vector<8x256xf32>
    %127 = vector.extract_strided_slice %125 {offsets = [0, 0], sizes = [8, 64], strides = [1, 1]} : vector<8x256xf32> to vector<8x64xf32>
    %128 = vector.extract_strided_slice %125 {offsets = [0, 64], sizes = [8, 64], strides = [1, 1]} : vector<8x256xf32> to vector<8x64xf32>
    %129 = vector.extract_strided_slice %126 {offsets = [0, 128], sizes = [8, 64], strides = [1, 1]} : vector<8x256xf32> to vector<8x64xf32>
    %130 = vector.extract_strided_slice %125 {offsets = [0, 192], sizes = [8, 64], strides = [1, 1]} : vector<8x256xf32> to vector<8x64xf32>
    %131 = arith.mulf %128, %113 : vector<8x64xf32>
    %132 = arith.mulf %127, %129 : vector<8x64xf32>
    %133 = arith.addf %131, %132 : vector<8x64xf32>
    %134 = math.tanh %133 : vector<8x64xf32>
    %135 = arith.mulf %130, %134 : vector<8x64xf32>
    %136 = vector.extract_strided_slice %5 {offsets = [6, 0, 0], sizes = [1, 8, 256], strides = [1, 1, 1]} : vector<8x8x256xf32> to vector<1x8x256xf32>
    %137 = vector.shape_cast %136 : vector<1x8x256xf32> to vector<8x256xf32>
    %138 = arith.addf %2, %137 : vector<8x256xf32>
    %cst_19 = arith.constant dense<0.000000e+00> : vector<8x256xf32>
    %139 = tpu.matmul %135, %1, %cst_19 {dimension_numbers = #tpu.dot_dimension_numbers<[1], [0], [0], [1], [0, 0, 1, 1], [], []>} : vector<8x64xf32>, vector<64x256xf32>, vector<8x256xf32> -> vector<8x256xf32>
    %140 = arith.addf %138, %139 : vector<8x256xf32>
    %141 = arith.negf %140 : vector<8x256xf32>
    %142 = math.exp %141 : vector<8x256xf32>
    %cst_20 = arith.constant 1.000000e+00 : f32
    %143 = vector.broadcast %cst_20 : f32 to vector<8x256xf32>
    %144 = arith.addf %143, %142 : vector<8x256xf32>
    %145 = arith.divf %143, %144 : vector<8x256xf32>
    %146 = math.tanh %140 : vector<8x256xf32>
    %147 = vector.extract_strided_slice %145 {offsets = [0, 0], sizes = [8, 64], strides = [1, 1]} : vector<8x256xf32> to vector<8x64xf32>
    %148 = vector.extract_strided_slice %145 {offsets = [0, 64], sizes = [8, 64], strides = [1, 1]} : vector<8x256xf32> to vector<8x64xf32>
    %149 = vector.extract_strided_slice %146 {offsets = [0, 128], sizes = [8, 64], strides = [1, 1]} : vector<8x256xf32> to vector<8x64xf32>
    %150 = vector.extract_strided_slice %145 {offsets = [0, 192], sizes = [8, 64], strides = [1, 1]} : vector<8x256xf32> to vector<8x64xf32>
    %151 = arith.mulf %148, %133 : vector<8x64xf32>
    %152 = arith.mulf %147, %149 : vector<8x64xf32>
    %153 = arith.addf %151, %152 : vector<8x64xf32>
    %154 = math.tanh %153 : vector<8x64xf32>
    %155 = arith.mulf %150, %154 : vector<8x64xf32>
    %156 = vector.extract_strided_slice %5 {offsets = [7, 0, 0], sizes = [1, 8, 256], strides = [1, 1, 1]} : vector<8x8x256xf32> to vector<1x8x256xf32>
    %157 = vector.shape_cast %156 : vector<1x8x256xf32> to vector<8x256xf32>
    %158 = arith.addf %2, %157 : vector<8x256xf32>
    %cst_21 = arith.constant dense<0.000000e+00> : vector<8x256xf32>
    %159 = tpu.matmul %155, %1, %cst_21 {dimension_numbers = #tpu.dot_dimension_numbers<[1], [0], [0], [1], [0, 0, 1, 1], [], []>} : vector<8x64xf32>, vector<64x256xf32>, vector<8x256xf32> -> vector<8x256xf32>
    %160 = arith.addf %158, %159 : vector<8x256xf32>
    %161 = arith.negf %160 : vector<8x256xf32>
    %162 = math.exp %161 : vector<8x256xf32>
    %cst_22 = arith.constant 1.000000e+00 : f32
    %163 = vector.broadcast %cst_22 : f32 to vector<8x256xf32>
    %164 = arith.addf %163, %162 : vector<8x256xf32>
    %165 = arith.divf %163, %164 : vector<8x256xf32>
    %166 = math.tanh %160 : vector<8x256xf32>
    %167 = vector.extract_strided_slice %165 {offsets = [0, 0], sizes = [8, 64], strides = [1, 1]} : vector<8x256xf32> to vector<8x64xf32>
    %168 = vector.extract_strided_slice %165 {offsets = [0, 64], sizes = [8, 64], strides = [1, 1]} : vector<8x256xf32> to vector<8x64xf32>
    %169 = vector.extract_strided_slice %166 {offsets = [0, 128], sizes = [8, 64], strides = [1, 1]} : vector<8x256xf32> to vector<8x64xf32>
    %170 = vector.extract_strided_slice %165 {offsets = [0, 192], sizes = [8, 64], strides = [1, 1]} : vector<8x256xf32> to vector<8x64xf32>
    %171 = arith.mulf %168, %153 : vector<8x64xf32>
    %172 = arith.mulf %167, %169 : vector<8x64xf32>
    %173 = arith.addf %171, %172 : vector<8x64xf32>
    %174 = math.tanh %173 : vector<8x64xf32>
    %175 = arith.mulf %170, %174 : vector<8x64xf32>
    %cst_23 = arith.constant dense<0.000000e+00> : vector<8x256xf32>
    %176 = tpu.matmul %175, %1, %cst_23 {dimension_numbers = #tpu.dot_dimension_numbers<[1], [0], [0], [1], [0, 0, 1, 1], [], []>} : vector<8x64xf32>, vector<64x256xf32>, vector<8x256xf32> -> vector<8x256xf32>
    %177 = arith.addf %2, %176 : vector<8x256xf32>
    %178 = arith.negf %177 : vector<8x256xf32>
    %179 = math.exp %178 : vector<8x256xf32>
    %cst_24 = arith.constant 1.000000e+00 : f32
    %180 = vector.broadcast %cst_24 : f32 to vector<8x256xf32>
    %181 = arith.addf %180, %179 : vector<8x256xf32>
    %182 = arith.divf %180, %181 : vector<8x256xf32>
    %183 = math.tanh %177 : vector<8x256xf32>
    %184 = vector.extract_strided_slice %182 {offsets = [0, 0], sizes = [8, 64], strides = [1, 1]} : vector<8x256xf32> to vector<8x64xf32>
    %185 = vector.extract_strided_slice %182 {offsets = [0, 64], sizes = [8, 64], strides = [1, 1]} : vector<8x256xf32> to vector<8x64xf32>
    %186 = vector.extract_strided_slice %183 {offsets = [0, 128], sizes = [8, 64], strides = [1, 1]} : vector<8x256xf32> to vector<8x64xf32>
    %187 = vector.extract_strided_slice %182 {offsets = [0, 192], sizes = [8, 64], strides = [1, 1]} : vector<8x256xf32> to vector<8x64xf32>
    %188 = arith.mulf %185, %173 : vector<8x64xf32>
    %189 = arith.mulf %184, %186 : vector<8x64xf32>
    %190 = arith.addf %188, %189 : vector<8x64xf32>
    %191 = math.tanh %190 : vector<8x64xf32>
    %192 = arith.mulf %187, %191 : vector<8x64xf32>
    %c32_i32_25 = arith.constant 32 : i32
    %193 = vector.broadcast %c32_i32_25 : i32 to vector<8x64xi32>
    %194 = arith.cmpi sge, %6, %193 : vector<8x64xi32>
    %c64_i32 = arith.constant 64 : i32
    %195 = vector.broadcast %c64_i32 : i32 to vector<8x64xi32>
    %196 = arith.cmpi slt, %6, %195 : vector<8x64xi32>
    %197 = arith.andi %194, %196 : vector<8x64xi1>
    %198 = arith.select %197, %190, %173 : vector<8x64xi1>, vector<8x64xf32>
    %199 = arith.select %197, %192, %175 : vector<8x64xi1>, vector<8x64xf32>
    %200 = tpu.concatenate %199, %198 in 1 : vector<8x64xf32>, vector<8x64xf32> -> vector<8x128xf32>
    %c0_26 = arith.constant 0 : index
    %c0_27 = arith.constant 0 : index
    %201 = vector.load %arg2[%c0_26, %c0_27] : memref<8x128xf32, #tpu.memory_space<vmem>>, vector<8x128xf32>
    tpu.vector_store %arg2[%c0_26, %c0_27], %200 {strides = array<i32>} : memref<8x128xf32, #tpu.memory_space<vmem>>, vector<8x128xf32>,
    return
  }
}

</mosaic_0001>

<bundles_post_ra>
// kernel: tpu_custom_call.1
= control target key start
LH: loop header
LB: loop body
LE: loop exit
PB: predicated region body
PF: predicated region fallthrough
CT: control target
= control target key end

     0   :  { %7 = vsyncpa [#allocation3], 0  ;;  %s1650_s0 = inlined_call_operand.vmem [shape: f32[64,8], index: 0, kind: input, shape index: {}]   ;;  %s1651_s1 = inlined_call_operand.hbm [shape: f32[80,256], index: 1, kind: input, shape index: {}]   ;;  %s1652_s2 = inlined_call_operand.hbm [shape: f32[8,128], index: 2, kind: output, shape index: {}]  }
   0x1   :  { %8 = vsyncpa [#allocation4], 0  ;;  %s15_s11 = sshll.u32 %s1651_s1, 4  ;;  %s1309_s12 = smov [#allocation2]   ;;  %s16_s11 = int_to_ptr.hbm [resolvable:$true] %s15_s11 }
   0x2   :  { %s17_s13 = sshll.u32 %s1309_s12, 4  ;;  %s1310_s14 = smov 256   ;;  %s18_s13 = int_to_ptr.vmem [resolvable:$true] %s17_s13 }
   0x3   :  { %s1311_s15 = smov 16  }
   0x4   :  { %23 = dma.hbm_to_vmem [thread:$0]  %s16_s11, 2560, %s18_s13, [#allocation3], %s1310_s14, %s1310_s14, %s1311_s15  }
   0x5   :  { %1305 = dma.done.wait [#allocation3], 2560  }
   0x6   :  { %1306 = vsyncadd [#allocation3], 4294964736  ;;  %v1333_v0 = vld [vmem:[#allocation2 + $0x80] sm:$0xff]  ;;  %v1335_v1 = vld [vmem:[#allocation2 + $0x70] sm:$0xff]  ;;  %vm56_vm0 = vcmask 64512   ;;  %v1312_v19 = vmov 0.0  }
   0x7   :  { %179 = vmatpush.msra.mxu2 %v1333_v0  ;;  %v1338_v2 = vld [vmem:[#allocation2 + $0x88] sm:$0xff]  ;;  %v1340_v3 = vld [vmem:[#allocation2 + $0x60] sm:$0xff]  ;;  %v1343_v4 = vld [vmem:[#allocation2 + $0x78] sm:$0xff]  ;;  %s1313_s17 = smov 64   ;;  %vm167_vm10 = vcmask 523264   ;;  %s1081_s7 = sshll.u32 %s1652_s2, 4  ;;  %s1082_s7 = int_to_ptr.hbm [resolvable:$true] %s1081_s7 }
   0x8   :  { %199 = vmatpush.msra.mxu3 %v1338_v2  ;;  %v1346_v5 = vld [vmem:[#allocation2 + $0x68] sm:$0xff]  ;;  %v1348_v6 = vld [vmem:[#allocation2 + $0x50] sm:$0xff]  ;;  %v28_v7 = vld [vmem:[#allocation2] sm:$0xff] }
   0x9   :  { %180 = vmatpush.msra.mxu2 %v1335_v1  ;;  %v1352_v8 = vld [vmem:[#allocation2 + $0x58] sm:$0xff]  ;;  %96 = vmatpush.msra.mxu0 %v28_v7  ;;  %v48_v9 = vld [vmem:[%s1650_s0] sm:$0xff]  ;;  %v29_v11 = vld [vmem:[#allocation2 + $0x8] sm:$0xff]  ;;  %v163_v7 = vlaneseq }
   0xa   :  { %200 = vmatpush.msra.mxu3 %v1343_v4  ;;  %v1357_v10 = vld [vmem:[#allocation2 + $0x40] sm:$0xff]  ;;  %1091 = vmatmul.msk.f32.vlgmr.msra.gmra.mxu0 %vm56_vm0, %v48_v9  ;;  %v1362_v12 = vld [vmem:[#allocation2 + $0x48] sm:$0xff]  ;;  %v1364_v13 = vld [vmem:[#allocation2 + $0x30] sm:$0xff] }
   0xb   :  { %181 = vmatpush.msra.mxu2 %v1340_v3  ;;  %137 = vmatpush.msra.mxu1 %v29_v11  ;;  %v1369_v14 = vld [vmem:[#allocation2 + $0x38] sm:$0xff]  ;;  %v1372_v15 = vld [vmem:[#allocation2 + $0x20] sm:$0xff]  ;;  %v1377_v16 = vld [vmem:[#allocation2 + $0x28] sm:$0xff] }
   0xc   :  { %201 = vmatpush.msra.mxu3 %v1346_v5  ;;  %1099 = vmatmul.msk.f32.vlgmr.msra.gmra.mxu1 %vm56_vm0, %v48_v9  ;;  %v1380_v17 = vld [vmem:[#allocation2 + $0x10] sm:$0xff]  ;;  %v1385_v18 = vld [vmem:[#allocation2 + $0x18] sm:$0xff]  ;;  %v49_v63 = vld [vmem:[%s1650_s0 + $0x8] sm:$0xff]  ;;  %v1464_v9 = vand.u32 127, %v163_v7 }
   0xd   :  { %182 = vmatpush.msra.mxu2 %v1348_v6  ;;  %582 = vmatpush.msrb.mxu0 %v1333_v0  ;;  %v1450_v20 = vld [vmem:[#allocation2 + $0x90] sm:$0xff]  ;;  %v1453_v28 = vld [vmem:[#allocation2 + $0x98] sm:$0xff] }
   0xe   :  { %202 = vmatpush.msra.mxu3 %v1352_v8  ;;  %602 = vmatpush.msrb.mxu1 %v1338_v2  ;;  %vm262_vm9 = vcmp.lt.s32.totalorder %v1464_v9, 32 }
   0xf   :  { %183 = vmatpush.msra.mxu2 %v1357_v10  ;;  %583 = vmatpush.msrb.mxu0 %v1335_v1 }
  0x10   :  { %203 = vmatpush.msra.mxu3 %v1362_v12  ;;  %603 = vmatpush.msrb.mxu1 %v1343_v4 }
  0x11   :  { %184 = vmatpush.msra.mxu2 %v1364_v13  ;;  %584 = vmatpush.msrb.mxu0 %v1340_v3 }
  0x12   :  { %204 = vmatpush.msra.mxu3 %v1369_v14  ;;  %604 = vmatpush.msrb.mxu1 %v1346_v5 }
  0x13   :  { %185 = vmatpush.msra.mxu2 %v1372_v15  ;;  %585 = vmatpush.msrb.mxu0 %v1348_v6 }
  0x14   :  { %205 = vmatpush.msra.mxu3 %v1377_v16  ;;  %605 = vmatpush.msrb.mxu1 %v1352_v8 }
  0x15   :  { %186 = vmatpush.msra.mxu2 %v1380_v17  ;;  %586 = vmatpush.msrb.mxu0 %v1357_v10 }
  0x16   :  { %187 = vmatmul.f32.vlgmr.msra.gmra.mxu2 %v1312_v19  ;;  %206 = vmatpush.msra.mxu3 %v1385_v18 }
  0x17   :  { %207 = vmatmul.f32.vlgmr.msra.gmra.mxu3 %v1312_v19  ;;  %287 = vmatpush.msrb.mxu2 %v1333_v0 }
  0x18   :  { %307 = vmatpush.msrb.mxu3 %v1338_v2  ;;  %587 = vmatpush.msrb.mxu0 %v1364_v13 }
  0x19   :  { %288 = vmatpush.msrb.mxu2 %v1335_v1  ;;  %606 = vmatpush.msrb.mxu1 %v1362_v12 }
  0x1a   :  { %308 = vmatpush.msrb.mxu3 %v1343_v4  ;;  %588 = vmatpush.msrb.mxu0 %v1372_v15 }
  0x1b   :  { %289 = vmatpush.msrb.mxu2 %v1340_v3  ;;  %607 = vmatpush.msrb.mxu1 %v1369_v14 }
  0x1c   :  { %309 = vmatpush.msrb.mxu3 %v1346_v5  ;;  %589 = vmatpush.msrb.mxu0 %v1380_v17 }
  0x1d   :  { %290 = vmatpush.msrb.mxu2 %v1348_v6  ;;  %608 = vmatpush.msrb.mxu1 %v1377_v16 }
  0x1e   :  { %310 = vmatpush.msrb.mxu3 %v1352_v8  ;;  %776 = vmatpush.msra.mxu0 %v1333_v0 }
  0x1f   :  { %291 = vmatpush.msrb.mxu2 %v1357_v10  ;;  %609 = vmatpush.msrb.mxu1 %v1385_v18 }
  0x20   :  { %311 = vmatpush.msrb.mxu3 %v1362_v12  ;;  %777 = vmatpush.msra.mxu0 %v1335_v1 }
  0x21   :  { %292 = vmatpush.msrb.mxu2 %v1364_v13  ;;  %796 = vmatpush.msra.mxu1 %v1338_v2 }
  0x22   :  { %312 = vmatpush.msrb.mxu3 %v1369_v14  ;;  %778 = vmatpush.msra.mxu0 %v1340_v3 }
  0x23   :  { %293 = vmatpush.msrb.mxu2 %v1372_v15  ;;  %797 = vmatpush.msra.mxu1 %v1343_v4 }
  0x24   :  { %313 = vmatpush.msrb.mxu3 %v1377_v16  ;;  %779 = vmatpush.msra.mxu0 %v1348_v6 }
  0x25   :  { %294 = vmatpush.msrb.mxu2 %v1380_v17  ;;  %798 = vmatpush.msra.mxu1 %v1346_v5 }
  0x26   :  { %314 = vmatpush.msrb.mxu3 %v1385_v18  ;;  %780 = vmatpush.msra.mxu0 %v1357_v10 }
  0x27   :  { %388 = vmatpush.msra.mxu2 %v1333_v0  ;;  %799 = vmatpush.msra.mxu1 %v1352_v8 }
  0x28   :  { %408 = vmatpush.msra.mxu3 %v1338_v2  ;;  %781 = vmatpush.msra.mxu0 %v1364_v13 }
  0x29   :  { %389 = vmatpush.msra.mxu2 %v1335_v1  ;;  %800 = vmatpush.msra.mxu1 %v1362_v12 }
  0x2a   :  { %409 = vmatpush.msra.mxu3 %v1343_v4  ;;  %782 = vmatpush.msra.mxu0 %v1372_v15 }
  0x2b   :  { %390 = vmatpush.msra.mxu2 %v1340_v3  ;;  %801 = vmatpush.msra.mxu1 %v1369_v14 }
  0x2c   :  { %410 = vmatpush.msra.mxu3 %v1346_v5  ;;  %783 = vmatpush.msra.mxu0 %v1380_v17 }
  0x2d   :  { %391 = vmatpush.msra.mxu2 %v1348_v6  ;;  %802 = vmatpush.msra.mxu1 %v1377_v16 }
  0x2e   :  { %411 = vmatpush.msra.mxu3 %v1352_v8  ;;  %1092 = vmatmul.msk.f32.gmra.mxu0 %vm56_vm0, %v49_v63 }
  0x2f   :  { %392 = vmatpush.msra.mxu2 %v1357_v10  ;;  %803 = vmatpush.msra.mxu1 %v1385_v18 }
  0x30   :  { %412 = vmatpush.msra.mxu3 %v1362_v12  ;;  %1100 = vmatmul.msk.f32.gmra.mxu1 %vm56_vm0, %v49_v63 }
  0x31   :  { %393 = vmatpush.msra.mxu2 %v1364_v13 }
  0x32   :  { %413 = vmatpush.msra.mxu3 %v1369_v14 }
  0x33   :  { %394 = vmatpush.msra.mxu2 %v1372_v15 }
  0x34   :  { %414 = vmatpush.msra.mxu3 %v1377_v16 }
  0x35   :  { %395 = vmatpush.msra.mxu2 %v1380_v17 }
  0x36   :  { %415 = vmatpush.msra.mxu3 %v1385_v18 }
  0x87   :  { %v98_v21 = vpop.f32.mrf.mxu0 }
  0x88   :  { %v165_v22 = vadd.f32 %v98_v21, %v1450_v20 }
  0x89   :  { %v139_v29 = vpop.f32.mrf.mxu1 }
  0x8a   :  { %v166_v30 = vadd.f32 %v139_v29, %v1453_v28 }
  0x99   :  { %v188_v23 = vpop.f32.mrf.mxu2 }
  0x9a   :  { %v211_v24 = vadd.f32 %v188_v23, %v165_v22  ;;  %v208_v31 = vpop.f32.mrf.mxu3 }
  0x9b   :  { %v212_v33 = vadd.f32 %v208_v31, %v166_v30 }
  0x9c   :  { %v1107_v25 = vmul.f32 -1.442695, %v211_v24 }
  0x9d   :  { %v1108_v45 = vmul.f32 -1.442695, %v212_v33 }
  0x9e   :  { %1147 = vpow2.f32 %v1107_v25 }
  0xa4   :  { %v1148_v26 = vpop.eup %1147 }
  0xa5   :  { %v219_v27 = vadd.f32 1.0, %v1148_v26 }
  0xa7   :  { %1149 = vrcp.f32 %v219_v27  ;;  %v232_v36 = vand.u32 2147483648, %v219_v27  ;;  %v230_v38 = vand.u32 2147483647, %v219_v27  ;;  %vm226_vm2 = vweird.f32 %v219_v27 }
  0xa8   :  { %1151 = vtanh.f32 %v212_v33 }
  0xa9   :  { %v233_v41 = vor.u32 1.1754944e-38, %v232_v36  ;;  %vm231_vm4 = vcmp.eq.f32.partialorder %v230_v38, 8.507059e+37  ;;  %1153 = vpow2.f32 %v1108_v45 }
  0xab   :  { %v101_v23 = vpop.f32.mrf.mxu0 }
  0xac   :  { %v274_v24 = vadd.f32 %v101_v23, %v1450_v20 }
  0xad   :  { %v1150_v32 = vpop.eup %1149  ;;  %v142_v31 = vpop.f32.mrf.mxu1 }
  0xae   :  { %v222_v34 = vmul.f32 %v1150_v32, %v219_v27  ;;  %vm227_vm1 = vweird.f32 %v1150_v32  ;;  %v1152_v40 = vpop.eup %1151 }
  0xaf   :  { %vm228_vm3 = vmor %vm226_vm2, %vm227_vm1  ;;  %v1154_v46 = vpop.eup %1153 }
  0xb0   :  { %v223_v35 = vsub.f32 1.0, %v222_v34  ;;  %v220_v47 = vadd.f32 1.0, %v1154_v46 }
  0xb2   :  { %v224_v37 = vmul.f32 %v1150_v32, %v223_v35  ;;  %1155 = vrcp.f32 %v220_v47  ;;  %vm241_vm5 = vweird.f32 %v220_v47  ;;  %v247_v55 = vand.u32 2147483648, %v220_v47 }
  0xb3   :  { %v245_v57 = vand.u32 2147483647, %v220_v47 }
  0xb4   :  { %v225_v39 = vadd.f32 %v1150_v32, %v224_v37  ;;  %v248_v58 = vor.u32 1.1754944e-38, %v247_v55 }
  0xb5   :  { %vm246_vm8 = vcmp.eq.f32.partialorder %v245_v57, 8.507059e+37 }
  0xb6   :  { %v229_v42 = vsel %vm228_vm3, %v1150_v32, %v225_v39  ;;  %v275_v32 = vadd.f32 %v142_v31, %v1453_v28 }
  0xb7   :  { %v234_v43 = vsel %vm231_vm4, %v233_v41, %v229_v42 }
  0xb8   :  { %v253_v44 = vmul.f32 %v1152_v40, %v234_v43  ;;  %v1156_v48 = vpop.eup %1155  ;;  %v252_v52 = vmul.f32 0.0, %v234_v43 }
  0xb9   :  { %v237_v49 = vmul.f32 %v1156_v48, %v220_v47  ;;  %vm242_vm6 = vweird.f32 %v1156_v48 }
  0xba   :  { %255 = vrot.lane.b32.xlu0 %v253_v44, %s1313_s17  ;;  %vm243_vm7 = vmor %vm241_vm5, %vm242_vm6 }
  0xbb   :  { %v238_v50 = vsub.f32 1.0, %v237_v49 }
  0xbd   :  { %v239_v51 = vmul.f32 %v1156_v48, %v238_v50 }
  0xbf   :  { %v240_v56 = vadd.f32 %v1156_v48, %v239_v51 }
  0xc1   :  { %v244_v59 = vsel %vm243_vm7, %v1156_v48, %v240_v56 }
  0xc2   :  { %v249_v61 = vsel %vm246_vm8, %v248_v58, %v244_v59 }
 0x12c   :  { %v256_v53 = vpop.permute.xlu0 %255 }
 0x12d   :  { %v258_v54 = vadd.f32 %v256_v53, %v252_v52 }
 0x12f   :  { %1157 = vtanh.f32 %v258_v54  ;;  %265 = vrot.lane.b32.xlu1 %v258_v54, %s1313_s17 }
 0x135   :  { %v1158_v60 = vpop.eup %1157 }
 0x136   :  { %v260_v62 = vmul.f32 %v1158_v60, %v249_v61 }
 0x138   :  { %270 = vrot.lane.b32.xlu0 %v260_v62, %s1313_s17 }
 0x1a1   :  { %v266_v11 = vpop.permute.xlu1 %265 }
 0x1a2   :  { %v268_v19 = vsel %vm262_vm9, %v266_v11, 0.0 }
 0x1a3   :  { %361 = vrot.lane.b32.xlu1 %v268_v19, %s1313_s17  ;;  %v50_v19 = vld [vmem:[%s1650_s0 + $0x10] sm:$0xff] }
 0x1a4   :  { %1093 = vmatmul.msk.f32.gmra.mxu0 %vm56_vm0, %v50_v19  ;;  %1101 = vmatmul.msk.f32.gmra.mxu1 %vm56_vm0, %v50_v19 }
 0x1aa   :  { %v271_v21 = vpop.permute.xlu0 %270 }
 0x1ab   :  { %v273_v22 = vsel %vm262_vm9, %v271_v21, 0.0 }
 0x1ac   :  { %1109 = vmatmul.msk.f32.vlgmr.msrb.gmra.mxu2 %vm167_vm10, %v273_v22  ;;  %1110 = vmatmul.msk.f32.vlgmr.msrb.gmra.mxu3 %vm167_vm10, %v273_v22 }
 0x1ad   :  { %485 = vmatpush.msrb.mxu2 %v1333_v0  ;;  %505 = vmatpush.msrb.mxu3 %v1338_v2 }
 0x1af   :  { %486 = vmatpush.msrb.mxu2 %v1335_v1  ;;  %506 = vmatpush.msrb.mxu3 %v1343_v4 }
 0x1b1   :  { %487 = vmatpush.msrb.mxu2 %v1340_v3  ;;  %507 = vmatpush.msrb.mxu3 %v1346_v5 }
 0x1b3   :  { %488 = vmatpush.msrb.mxu2 %v1348_v6  ;;  %508 = vmatpush.msrb.mxu3 %v1352_v8 }
 0x1b5   :  { %489 = vmatpush.msrb.mxu2 %v1357_v10  ;;  %509 = vmatpush.msrb.mxu3 %v1362_v12 }
 0x1b7   :  { %490 = vmatpush.msrb.mxu2 %v1364_v13  ;;  %510 = vmatpush.msrb.mxu3 %v1369_v14 }
 0x1b9   :  { %491 = vmatpush.msrb.mxu2 %v1372_v15  ;;  %511 = vmatpush.msrb.mxu3 %v1377_v16 }
 0x1bb   :  { %492 = vmatpush.msrb.mxu2 %v1380_v17  ;;  %512 = vmatpush.msrb.mxu3 %v1385_v18 }
 0x215   :  { %v362_v53 = vpop.permute.xlu1 %361 }
 0x221   :  { %v104_v22 = vpop.f32.mrf.mxu0 }
 0x222   :  { %v373_v23 = vadd.f32 %v104_v22, %v1450_v20 }
 0x22f   :  { %v296_v25 = vpop.f32.mrf.mxu2  ;;  %v316_v33 = vpop.f32.mrf.mxu3 }
 0x230   :  { %v319_v26 = vadd.f32 %v296_v25, %v274_v24  ;;  %v320_v35 = vadd.f32 %v316_v33, %v275_v32 }
 0x232   :  { %v1111_v27 = vmul.f32 -1.442695, %v319_v26  ;;  %v1112_v47 = vmul.f32 -1.442695, %v320_v35 }
 0x234   :  { %1159 = vpow2.f32 %v1111_v27 }
 0x23a   :  { %v1160_v29 = vpop.eup %1159 }
 0x23b   :  { %v327_v30 = vadd.f32 1.0, %v1160_v29 }
 0x23d   :  { %1161 = vrcp.f32 %v327_v30  ;;  %v340_v38 = vand.u32 2147483648, %v327_v30  ;;  %v338_v40 = vand.u32 2147483647, %v327_v30  ;;  %vm334_vm12 = vweird.f32 %v327_v30 }
 0x23e   :  { %1163 = vtanh.f32 %v320_v35 }
 0x23f   :  { %v341_v42 = vor.u32 1.1754944e-38, %v340_v38  ;;  %vm339_vm14 = vcmp.eq.f32.partialorder %v338_v40, 8.507059e+37  ;;  %1165 = vpow2.f32 %v1112_v47 }
 0x243   :  { %v1162_v34 = vpop.eup %1161 }
 0x244   :  { %v330_v36 = vmul.f32 %v1162_v34, %v327_v30  ;;  %vm335_vm11 = vweird.f32 %v1162_v34  ;;  %v1164_v44 = vpop.eup %1163  ;;  %v145_v30 = vpop.f32.mrf.mxu1 }
 0x245   :  { %vm336_vm13 = vmor %vm334_vm12, %vm335_vm11  ;;  %v1166_v48 = vpop.eup %1165  ;;  %v374_v31 = vadd.f32 %v145_v30, %v1453_v28 }
 0x246   :  { %v331_v37 = vsub.f32 1.0, %v330_v36  ;;  %v328_v49 = vadd.f32 1.0, %v1166_v48 }
 0x248   :  { %v332_v39 = vmul.f32 %v1162_v34, %v331_v37  ;;  %1167 = vrcp.f32 %v328_v49  ;;  %v355_v59 = vand.u32 2147483648, %v328_v49  ;;  %vm349_vm1 = vweird.f32 %v328_v49 }
 0x249   :  { %v353_v60 = vand.u32 2147483647, %v328_v49 }
 0x24a   :  { %v333_v41 = vadd.f32 %v1162_v34, %v332_v39  ;;  %v356_v62 = vor.u32 1.1754944e-38, %v355_v59 }
 0x24b   :  { %vm354_vm3 = vcmp.eq.f32.partialorder %v353_v60, 8.507059e+37 }
 0x24c   :  { %v337_v43 = vsel %vm336_vm13, %v1162_v34, %v333_v41 }
 0x24d   :  { %v342_v45 = vsel %vm339_vm14, %v341_v42, %v337_v43 }
 0x24e   :  { %v365_v46 = vmul.f32 %v1164_v44, %v342_v45  ;;  %v1168_v50 = vpop.eup %1167  ;;  %v364_v55 = vmul.f32 %v362_v53, %v342_v45 }
 0x24f   :  { %v345_v51 = vmul.f32 %v1168_v50, %v328_v49  ;;  %vm350_vm15 = vweird.f32 %v1168_v50 }
 0x250   :  { %367 = vrot.lane.b32.xlu2 %v365_v46, %s1313_s17  ;;  %vm351_vm2 = vmor %vm349_vm1, %vm350_vm15 }
 0x251   :  { %v346_v52 = vsub.f32 1.0, %v345_v51 }
 0x253   :  { %v347_v54 = vmul.f32 %v1168_v50, %v346_v52 }
 0x255   :  { %v348_v58 = vadd.f32 %v1168_v50, %v347_v54 }
 0x257   :  { %v352_v61 = vsel %vm351_vm2, %v1168_v50, %v348_v58 }
 0x258   :  { %v357_v7 = vsel %vm354_vm3, %v356_v62, %v352_v61 }
 0x2aa   :  { %v368_v56 = vpop.permute.xlu2 %367 }
 0x2ab   :  { %v1489_v57 = vadd.f32 %v368_v56, %v364_v55 }
 0x2ad   :  { %1169 = vtanh.f32 %v1489_v57 }
 0x2b3   :  { %v1170_v63 = vpop.eup %1169 }
 0x2b4   :  { %v372_v11 = vmul.f32 %v1170_v63, %v357_v7 }
 0x2b6   :  { %376 = vrot.lane.b32.xlu2 %v372_v11, %s1313_s17 }
 0x310   :  { %v377_v21 = vpop.permute.xlu2 %376 }
 0x311   :  { %1113 = vmatmul.msk.f32.vlgmr.msra.gmra.mxu2 %vm167_vm10, %v377_v21  ;;  %1114 = vmatmul.msk.f32.vlgmr.msra.gmra.mxu3 %vm167_vm10, %v377_v21 }
 0x312   :  { %679 = vmatpush.msra.mxu2 %v1333_v0  ;;  %699 = vmatpush.msra.mxu3 %v1338_v2 }
 0x314   :  { %680 = vmatpush.msra.mxu2 %v1335_v1  ;;  %700 = vmatpush.msra.mxu3 %v1343_v4 }
 0x316   :  { %681 = vmatpush.msra.mxu2 %v1340_v3  ;;  %701 = vmatpush.msra.mxu3 %v1346_v5 }
 0x318   :  { %682 = vmatpush.msra.mxu2 %v1348_v6  ;;  %702 = vmatpush.msra.mxu3 %v1352_v8 }
 0x31a   :  { %683 = vmatpush.msra.mxu2 %v1357_v10  ;;  %703 = vmatpush.msra.mxu3 %v1362_v12 }
 0x31c   :  { %684 = vmatpush.msra.mxu2 %v1364_v13  ;;  %704 = vmatpush.msra.mxu3 %v1369_v14 }
 0x31e   :  { %685 = vmatpush.msra.mxu2 %v1372_v15  ;;  %705 = vmatpush.msra.mxu3 %v1377_v16 }
 0x320   :  { %686 = vmatpush.msra.mxu2 %v1380_v17  ;;  %706 = vmatpush.msra.mxu3 %v1385_v18 }
 0x394   :  { %v397_v24 = vpop.f32.mrf.mxu2  ;;  %v417_v32 = vpop.f32.mrf.mxu3 }
 0x395   :  { %v420_v25 = vadd.f32 %v397_v24, %v373_v23  ;;  %v421_v34 = vadd.f32 %v417_v32, %v374_v31 }
 0x397   :  { %v1115_v26 = vmul.f32 -1.442695, %v420_v25  ;;  %v1116_v46 = vmul.f32 -1.442695, %v421_v34 }
 0x399   :  { %1171 = vpow2.f32 %v1115_v26 }
 0x39f   :  { %v1172_v27 = vpop.eup %1171 }
 0x3a0   :  { %v428_v29 = vadd.f32 1.0, %v1172_v27 }
 0x3a2   :  { %1173 = vrcp.f32 %v428_v29  ;;  %v441_v37 = vand.u32 2147483648, %v428_v29  ;;  %v439_v39 = vand.u32 2147483647, %v428_v29  ;;  %vm435_vm5 = vweird.f32 %v428_v29 }
 0x3a3   :  { %1175 = vtanh.f32 %v421_v34 }
 0x3a4   :  { %v442_v41 = vor.u32 1.1754944e-38, %v441_v37  ;;  %vm440_vm7 = vcmp.eq.f32.partialorder %v439_v39, 8.507059e+37  ;;  %1177 = vpow2.f32 %v1116_v46 }
 0x3a8   :  { %v1174_v33 = vpop.eup %1173 }
 0x3a9   :  { %v431_v35 = vmul.f32 %v1174_v33, %v428_v29  ;;  %vm436_vm4 = vweird.f32 %v1174_v33  ;;  %v1176_v43 = vpop.eup %1175 }
 0x3aa   :  { %vm437_vm6 = vmor %vm435_vm5, %vm436_vm4  ;;  %v1178_v47 = vpop.eup %1177 }
 0x3ab   :  { %v432_v36 = vsub.f32 1.0, %v431_v35  ;;  %v429_v48 = vadd.f32 1.0, %v1178_v47  ;;  %v52_v47 = vld [vmem:[%s1650_s0 + $0x20] sm:$0xff] }
 0x3ad   :  { %v433_v38 = vmul.f32 %v1174_v33, %v432_v36  ;;  %1179 = vrcp.f32 %v429_v48  ;;  %v456_v58 = vand.u32 2147483648, %v429_v48  ;;  %vm450_vm9 = vweird.f32 %v429_v48 }
 0x3ae   :  { %v454_v59 = vand.u32 2147483647, %v429_v48 }
 0x3af   :  { %v434_v40 = vadd.f32 %v1174_v33, %v433_v38  ;;  %v457_v61 = vor.u32 1.1754944e-38, %v456_v58 }
 0x3b0   :  { %vm455_vm12 = vcmp.eq.f32.partialorder %v454_v59, 8.507059e+37 }
 0x3b1   :  { %v438_v42 = vsel %vm437_vm6, %v1174_v33, %v434_v40 }
 0x3b2   :  { %v443_v44 = vsel %vm440_vm7, %v442_v41, %v438_v42 }
 0x3b3   :  { %v462_v45 = vmul.f32 %v1176_v43, %v443_v44  ;;  %v1180_v49 = vpop.eup %1179  ;;  %v461_v53 = vmul.f32 %v443_v44, %v1489_v57  ;;  %v51_v57 = vld [vmem:[%s1650_s0 + $0x18] sm:$0xff] }
 0x3b4   :  { %v446_v50 = vmul.f32 %v1180_v49, %v429_v48  ;;  %vm451_vm8 = vweird.f32 %v1180_v49  ;;  %1094 = vmatmul.msk.f32.gmra.mxu0 %vm56_vm0, %v51_v57  ;;  %1102 = vmatmul.msk.f32.gmra.mxu1 %vm56_vm0, %v51_v57  ;;  %v53_v48 = vld [vmem:[%s1650_s0 + $0x28] sm:$0xff] }
 0x3b5   :  { %464 = vrot.lane.b32.xlu0 %v462_v45, %s1313_s17  ;;  %vm452_vm11 = vmor %vm450_vm9, %vm451_vm8 }
 0x3b6   :  { %v447_v51 = vsub.f32 1.0, %v446_v50 }
 0x3b8   :  { %v448_v52 = vmul.f32 %v1180_v49, %v447_v51 }
 0x3ba   :  { %v449_v56 = vadd.f32 %v1180_v49, %v448_v52  ;;  %v54_v52 = vld [vmem:[%s1650_s0 + $0x30] sm:$0xff] }
 0x3bc   :  { %v453_v60 = vsel %vm452_vm11, %v1180_v49, %v449_v56  ;;  %1095 = vmatmul.msk.f32.gmra.mxu0 %vm56_vm0, %v52_v47  ;;  %1103 = vmatmul.msk.f32.gmra.mxu1 %vm56_vm0, %v52_v47 }
 0x3bd   :  { %v458_v63 = vsel %vm455_vm12, %v457_v61, %v453_v60  ;;  %v55_v60 = vld [vmem:[%s1650_s0 + $0x38] sm:$0xff]  ;;  %s1314_s0 = smov [#allocation5]  }
 0x3be   :  { %s1079_s4 = sshll.u32 %s1314_s0, 4  ;;  %s1080_s4 = int_to_ptr.vmem [resolvable:$true] %s1079_s4 }
 0x3c4   :  { %1096 = vmatmul.msk.f32.gmra.mxu0 %vm56_vm0, %v53_v48  ;;  %1104 = vmatmul.msk.f32.gmra.mxu1 %vm56_vm0, %v53_v48 }
 0x3cc   :  { %1097 = vmatmul.msk.f32.gmra.mxu0 %vm56_vm0, %v54_v52  ;;  %1105 = vmatmul.msk.f32.gmra.mxu1 %vm56_vm0, %v54_v52 }
 0x3d4   :  { %1098 = vmatmul.msk.f32.gmra.mxu0 %vm56_vm0, %v55_v60  ;;  %1106 = vmatmul.msk.f32.gmra.mxu1 %vm56_vm0, %v55_v60 }
 0x427   :  { %v465_v54 = vpop.permute.xlu0 %464 }
 0x428   :  { %v1520_v55 = vadd.f32 %v465_v54, %v461_v53 }
 0x42a   :  { %1181 = vtanh.f32 %v1520_v55 }
 0x430   :  { %v1182_v62 = vpop.eup %1181 }
 0x431   :  { %v469_v7 = vmul.f32 %v1182_v62, %v458_v63  ;;  %v107_v19 = vpop.f32.mrf.mxu0  ;;  %v148_v27 = vpop.f32.mrf.mxu1 }
 0x432   :  { %v470_v21 = vadd.f32 %v107_v19, %v1450_v20  ;;  %v471_v29 = vadd.f32 %v148_v27, %v1453_v28 }
 0x433   :  { %473 = vrot.lane.b32.xlu1 %v469_v7, %s1313_s17 }
 0x4a5   :  { %v474_v11 = vpop.permute.xlu1 %473 }
 0x4a6   :  { %1117 = vmatmul.msk.f32.vlgmr.msrb.gmra.mxu2 %vm167_vm10, %v474_v11  ;;  %1118 = vmatmul.msk.f32.vlgmr.msrb.gmra.mxu3 %vm167_vm10, %v474_v11 }
 0x4a7   :  { %873 = vmatpush.msrb.mxu2 %v1333_v0  ;;  %893 = vmatpush.msrb.mxu3 %v1338_v2 }
 0x4a9   :  { %874 = vmatpush.msrb.mxu2 %v1335_v1  ;;  %894 = vmatpush.msrb.mxu3 %v1343_v4 }
 0x4ab   :  { %875 = vmatpush.msrb.mxu2 %v1340_v3  ;;  %895 = vmatpush.msrb.mxu3 %v1346_v5 }
 0x4ad   :  { %876 = vmatpush.msrb.mxu2 %v1348_v6  ;;  %896 = vmatpush.msrb.mxu3 %v1352_v8 }
 0x4af   :  { %877 = vmatpush.msrb.mxu2 %v1357_v10  ;;  %897 = vmatpush.msrb.mxu3 %v1362_v12 }
 0x4b1   :  { %878 = vmatpush.msrb.mxu2 %v1364_v13  ;;  %898 = vmatpush.msrb.mxu3 %v1369_v14 }
 0x4b3   :  { %879 = vmatpush.msrb.mxu2 %v1372_v15  ;;  %899 = vmatpush.msrb.mxu3 %v1377_v16 }
 0x4b5   :  { %880 = vmatpush.msrb.mxu2 %v1380_v17  ;;  %900 = vmatpush.msrb.mxu3 %v1385_v18 }
 0x529   :  { %v494_v22 = vpop.f32.mrf.mxu2  ;;  %v514_v30 = vpop.f32.mrf.mxu3 }
 0x52a   :  { %v517_v23 = vadd.f32 %v494_v22, %v470_v21  ;;  %v518_v32 = vadd.f32 %v514_v30, %v471_v29 }
 0x52c   :  { %v1119_v24 = vmul.f32 -1.442695, %v517_v23  ;;  %v1120_v44 = vmul.f32 -1.442695, %v518_v32 }
 0x52e   :  { %1183 = vpow2.f32 %v1119_v24 }
 0x534   :  { %v1184_v25 = vpop.eup %1183 }
 0x535   :  { %v525_v26 = vadd.f32 1.0, %v1184_v25 }
 0x537   :  { %1185 = vrcp.f32 %v525_v26  ;;  %v538_v35 = vand.u32 2147483648, %v525_v26  ;;  %v536_v37 = vand.u32 2147483647, %v525_v26  ;;  %vm532_vm14 = vweird.f32 %v525_v26 }
 0x538   :  { %1187 = vtanh.f32 %v518_v32 }
 0x539   :  { %v539_v39 = vor.u32 1.1754944e-38, %v538_v35  ;;  %vm537_vm1 = vcmp.eq.f32.partialorder %v536_v37, 8.507059e+37  ;;  %1189 = vpow2.f32 %v1120_v44 }
 0x53d   :  { %v1186_v31 = vpop.eup %1185 }
 0x53e   :  { %v528_v33 = vmul.f32 %v1186_v31, %v525_v26  ;;  %vm533_vm13 = vweird.f32 %v1186_v31  ;;  %v1188_v41 = vpop.eup %1187 }
 0x53f   :  { %vm534_vm15 = vmor %vm532_vm14, %vm533_vm13  ;;  %v1190_v45 = vpop.eup %1189 }
 0x540   :  { %v529_v34 = vsub.f32 1.0, %v528_v33  ;;  %v526_v46 = vadd.f32 1.0, %v1190_v45 }
 0x542   :  { %v530_v36 = vmul.f32 %v1186_v31, %v529_v34  ;;  %1191 = vrcp.f32 %v526_v46  ;;  %v553_v61 = vand.u32 2147483648, %v526_v46  ;;  %vm547_vm3 = vweird.f32 %v526_v46 }
 0x543   :  { %v551_v62 = vand.u32 2147483647, %v526_v46 }
 0x544   :  { %v531_v38 = vadd.f32 %v1186_v31, %v530_v36  ;;  %v554_v63 = vor.u32 1.1754944e-38, %v553_v61 }
 0x545   :  { %vm552_vm5 = vcmp.eq.f32.partialorder %v551_v62, 8.507059e+37 }
 0x546   :  { %v535_v40 = vsel %vm534_vm15, %v1186_v31, %v531_v38 }
 0x547   :  { %v540_v42 = vsel %vm537_vm1, %v539_v39, %v535_v40 }
 0x548   :  { %v559_v43 = vmul.f32 %v1188_v41, %v540_v42  ;;  %v1192_v49 = vpop.eup %1191  ;;  %v558_v54 = vmul.f32 %v540_v42, %v1520_v55 }
 0x549   :  { %v543_v50 = vmul.f32 %v1192_v49, %v526_v46  ;;  %vm548_vm2 = vweird.f32 %v1192_v49 }
 0x54a   :  { %561 = vrot.lane.b32.xlu2 %v559_v43, %s1313_s17  ;;  %vm549_vm4 = vmor %vm547_vm3, %vm548_vm2 }
 0x54b   :  { %v544_v51 = vsub.f32 1.0, %v543_v50 }
 0x54d   :  { %v545_v53 = vmul.f32 %v1192_v49, %v544_v51 }
 0x54f   :  { %v546_v59 = vadd.f32 %v1192_v49, %v545_v53 }
 0x551   :  { %v550_v55 = vsel %vm549_vm4, %v1192_v49, %v546_v59 }
 0x552   :  { %v555_v57 = vsel %vm552_vm5, %v554_v63, %v550_v55 }
 0x5a4   :  { %v562_v56 = vpop.permute.xlu2 %561 }
 0x5a5   :  { %v1566_v58 = vadd.f32 %v562_v56, %v558_v54 }
 0x5a7   :  { %1193 = vtanh.f32 %v1566_v58 }
 0x5ad   :  { %v1194_v7 = vpop.eup %1193 }
 0x5ae   :  { %v566_v11 = vmul.f32 %v1194_v7, %v555_v57 }
 0x5b0   :  { %570 = vrot.lane.b32.xlu0 %v566_v11, %s1313_s17 }
 0x622   :  { %v571_v19 = vpop.permute.xlu0 %570 }
 0x623   :  { %1121 = vmatmul.msk.f32.vlgmr.msrb.gmra.mxu0 %vm167_vm10, %v571_v19  ;;  %1122 = vmatmul.msk.f32.vlgmr.msrb.gmra.mxu1 %vm167_vm10, %v571_v19 }
 0x624   :  { %968 = vmatpush.msrb.mxu0 %v1333_v0  ;;  %988 = vmatpush.msrb.mxu1 %v1338_v2  ;;  %v110_v0 = vpop.f32.mrf.mxu0  ;;  %v151_v2 = vpop.f32.mrf.mxu1 }
 0x626   :  { %969 = vmatpush.msrb.mxu0 %v1335_v1  ;;  %989 = vmatpush.msrb.mxu1 %v1343_v4 }
 0x628   :  { %970 = vmatpush.msrb.mxu0 %v1340_v3  ;;  %990 = vmatpush.msrb.mxu1 %v1346_v5 }
 0x62a   :  { %971 = vmatpush.msrb.mxu0 %v1348_v6  ;;  %991 = vmatpush.msrb.mxu1 %v1352_v8  ;;  %v567_v8 = vadd.f32 %v110_v0, %v1450_v20 }
 0x62c   :  { %972 = vmatpush.msrb.mxu0 %v1357_v10  ;;  %992 = vmatpush.msrb.mxu1 %v1362_v12  ;;  %v1593_v1 = vpop.f32.mrf.mxu0  ;;  %v1597_v4 = vpop.f32.mrf.mxu1 }
 0x62d   :  { %v664_v54 = vadd.f32 %v1593_v1, %v1450_v20  ;;  %v665_v55 = vadd.f32 %v1597_v4, %v1453_v28 }
 0x62e   :  { %973 = vmatpush.msrb.mxu0 %v1364_v13  ;;  %993 = vmatpush.msrb.mxu1 %v1369_v14 }
 0x630   :  { %974 = vmatpush.msrb.mxu0 %v1372_v15  ;;  %994 = vmatpush.msrb.mxu1 %v1377_v16 }
 0x632   :  { %975 = vmatpush.msrb.mxu0 %v1380_v17  ;;  %995 = vmatpush.msrb.mxu1 %v1385_v18  ;;  %v568_v18 = vadd.f32 %v151_v2, %v1453_v28 }
 0x634   :  { %v1595_v3 = vpop.f32.mrf.mxu0  ;;  %v1601_v6 = vpop.f32.mrf.mxu1 }
 0x63c   :  { %v1599_v5 = vpop.f32.mrf.mxu0  ;;  %v1604_v14 = vpop.f32.mrf.mxu1 }
 0x6a0   :  { %v591_v10 = vpop.f32.mrf.mxu0  ;;  %v611_v17 = vpop.f32.mrf.mxu1 }
 0x6a1   :  { %v614_v12 = vadd.f32 %v591_v10, %v567_v8  ;;  %v615_v22 = vadd.f32 %v611_v17, %v568_v18 }
 0x6a3   :  { %v1123_v13 = vmul.f32 -1.442695, %v614_v12  ;;  %v1124_v35 = vmul.f32 -1.442695, %v615_v22 }
 0x6a5   :  { %1195 = vpow2.f32 %v1123_v13 }
 0x6ab   :  { %v1196_v15 = vpop.eup %1195 }
 0x6ac   :  { %v622_v16 = vadd.f32 1.0, %v1196_v15 }
 0x6ae   :  { %1197 = vrcp.f32 %v622_v16  ;;  %v635_v25 = vand.u32 2147483648, %v622_v16  ;;  %v633_v27 = vand.u32 2147483647, %v622_v16  ;;  %vm629_vm6 = vweird.f32 %v622_v16 }
 0x6af   :  { %1199 = vtanh.f32 %v615_v22 }
 0x6b0   :  { %v636_v30 = vor.u32 1.1754944e-38, %v635_v25  ;;  %vm634_vm8 = vcmp.eq.f32.partialorder %v633_v27, 8.507059e+37  ;;  %1201 = vpow2.f32 %v1124_v35 }
 0x6b4   :  { %v1198_v21 = vpop.eup %1197 }
 0x6b5   :  { %v625_v23 = vmul.f32 %v1198_v21, %v622_v16  ;;  %vm630_vm0 = vweird.f32 %v1198_v21  ;;  %v1200_v32 = vpop.eup %1199 }
 0x6b6   :  { %vm631_vm7 = vmor %vm629_vm6, %vm630_vm0  ;;  %v1202_v36 = vpop.eup %1201 }
 0x6b7   :  { %v626_v24 = vsub.f32 1.0, %v625_v23  ;;  %v623_v37 = vadd.f32 1.0, %v1202_v36 }
 0x6b9   :  { %v627_v26 = vmul.f32 %v1198_v21, %v626_v24  ;;  %1203 = vrcp.f32 %v623_v37  ;;  %v650_v46 = vand.u32 2147483648, %v623_v37  ;;  %vm644_vm11 = vweird.f32 %v623_v37 }
 0x6ba   :  { %v648_v47 = vand.u32 2147483647, %v623_v37 }
 0x6bb   :  { %v628_v29 = vadd.f32 %v1198_v21, %v627_v26  ;;  %v651_v49 = vor.u32 1.1754944e-38, %v650_v46 }
 0x6bc   :  { %vm649_vm13 = vcmp.eq.f32.partialorder %v648_v47, 8.507059e+37 }
 0x6bd   :  { %v632_v31 = vsel %vm631_vm7, %v1198_v21, %v628_v29 }
 0x6be   :  { %v637_v33 = vsel %vm634_vm8, %v636_v30, %v632_v31 }
 0x6bf   :  { %v656_v34 = vmul.f32 %v1200_v32, %v637_v33  ;;  %v1204_v38 = vpop.eup %1203  ;;  %v655_v42 = vmul.f32 %v637_v33, %v1566_v58 }
 0x6c0   :  { %v640_v39 = vmul.f32 %v1204_v38, %v623_v37  ;;  %vm645_vm9 = vweird.f32 %v1204_v38  ;;  %v761_v37 = vadd.f32 %v1595_v3, %v1450_v20 }
 0x6c1   :  { %658 = vrot.lane.b32.xlu1 %v656_v34, %s1313_s17  ;;  %vm646_vm12 = vmor %vm644_vm11, %vm645_vm9 }
 0x6c2   :  { %v641_v40 = vsub.f32 1.0, %v640_v39 }
 0x6c4   :  { %v642_v41 = vmul.f32 %v1204_v38, %v641_v40 }
 0x6c6   :  { %v643_v45 = vadd.f32 %v1204_v38, %v642_v41 }
 0x6c8   :  { %v647_v48 = vsel %vm646_vm12, %v1204_v38, %v643_v45 }
 0x6c9   :  { %v652_v51 = vsel %vm649_vm13, %v651_v49, %v647_v48 }
 0x733   :  { %v659_v43 = vpop.permute.xlu1 %658 }
 0x734   :  { %v661_v44 = vadd.f32 %v659_v43, %v655_v42 }
 0x736   :  { %1205 = vtanh.f32 %v661_v44 }
 0x73c   :  { %v1206_v50 = vpop.eup %1205 }
 0x73d   :  { %v663_v52 = vmul.f32 %v1206_v50, %v652_v51 }
 0x73f   :  { %667 = vrot.lane.b32.xlu2 %v663_v52, %s1313_s17 }
 0x799   :  { %v668_v53 = vpop.permute.xlu2 %667 }
 0x79a   :  { %1125 = vmatmul.msk.f32.vlgmr.msra.gmra.mxu2 %vm167_vm10, %v668_v53  ;;  %1126 = vmatmul.msk.f32.vlgmr.msra.gmra.mxu3 %vm167_vm10, %v668_v53 }
 0x81d   :  { %v688_v56 = vpop.f32.mrf.mxu2  ;;  %v708_v62 = vpop.f32.mrf.mxu3 }
 0x81e   :  { %v711_v58 = vadd.f32 %v688_v56, %v664_v54  ;;  %v712_v7 = vadd.f32 %v708_v62, %v665_v55 }
 0x820   :  { %v1127_v59 = vmul.f32 -1.442695, %v711_v58  ;;  %v1128_v4 = vmul.f32 -1.442695, %v712_v7 }
 0x822   :  { %1207 = vpow2.f32 %v1127_v59 }
 0x828   :  { %v1208_v60 = vpop.eup %1207 }
 0x829   :  { %v719_v61 = vadd.f32 1.0, %v1208_v60 }
 0x82b   :  { %1209 = vrcp.f32 %v719_v61  ;;  %v732_v19 = vand.u32 2147483648, %v719_v61  ;;  %v730_v1 = vand.u32 2147483647, %v719_v61  ;;  %vm726_vm15 = vweird.f32 %v719_v61 }
 0x82c   :  { %1211 = vtanh.f32 %v712_v7 }
 0x82d   :  { %v733_v8 = vor.u32 1.1754944e-38, %v732_v19  ;;  %vm731_vm2 = vcmp.eq.f32.partialorder %v730_v1, 8.507059e+37  ;;  %1213 = vpow2.f32 %v1128_v4 }
 0x831   :  { %v1210_v63 = vpop.eup %1209 }
 0x832   :  { %v722_v57 = vmul.f32 %v1210_v63, %v719_v61  ;;  %vm727_vm14 = vweird.f32 %v1210_v63  ;;  %v1212_v12 = vpop.eup %1211 }
 0x833   :  { %vm728_vm1 = vmor %vm726_vm15, %vm727_vm14  ;;  %v1214_v16 = vpop.eup %1213 }
 0x834   :  { %v723_v11 = vsub.f32 1.0, %v722_v57  ;;  %v720_v17 = vadd.f32 1.0, %v1214_v16 }
 0x836   :  { %v724_v0 = vmul.f32 %v1210_v63, %v723_v11  ;;  %1215 = vrcp.f32 %v720_v17  ;;  %v747_v29 = vand.u32 2147483648, %v720_v17  ;;  %vm741_vm4 = vweird.f32 %v720_v17 }
 0x837   :  { %v745_v30 = vand.u32 2147483647, %v720_v17 }
 0x838   :  { %v725_v2 = vadd.f32 %v1210_v63, %v724_v0  ;;  %v748_v32 = vor.u32 1.1754944e-38, %v747_v29 }
 0x839   :  { %vm746_vm0 = vcmp.eq.f32.partialorder %v745_v30, 8.507059e+37 }
 0x83a   :  { %v729_v10 = vsel %vm728_vm1, %v1210_v63, %v725_v2 }
 0x83b   :  { %v734_v13 = vsel %vm731_vm2, %v733_v8, %v729_v10 }
 0x83c   :  { %v753_v15 = vmul.f32 %v1212_v12, %v734_v13  ;;  %v1216_v18 = vpop.eup %1215  ;;  %v752_v24 = vmul.f32 %v734_v13, %v661_v44  ;;  %v762_v44 = vadd.f32 %v1601_v6, %v1453_v28  ;;  %v1255_v13 = vld [vmem:[#allocation2 + $0x90] sm:$0xff] }
 0x83d   :  { %v737_v21 = vmul.f32 %v1216_v18, %v720_v17  ;;  %vm742_vm3 = vweird.f32 %v1216_v18 }
 0x83e   :  { %755 = vrot.lane.b32.xlu0 %v753_v15, %s1313_s17  ;;  %vm743_vm5 = vmor %vm741_vm4, %vm742_vm3  ;;  %v858_v15 = vadd.f32 %v1255_v13, %v1599_v5 }
 0x83f   :  { %v738_v22 = vsub.f32 1.0, %v737_v21 }
 0x841   :  { %v739_v23 = vmul.f32 %v1216_v18, %v738_v22 }
 0x843   :  { %v740_v27 = vadd.f32 %v1216_v18, %v739_v23  ;;  %v1256_v23 = vld [vmem:[#allocation2 + $0x98] sm:$0xff] }
 0x845   :  { %v744_v31 = vsel %vm743_vm5, %v1216_v18, %v740_v27 }
 0x846   :  { %v749_v34 = vsel %vm746_vm0, %v748_v32, %v744_v31 }
 0x8b0   :  { %v756_v25 = vpop.permute.xlu0 %755 }
 0x8b1   :  { %v758_v26 = vadd.f32 %v756_v25, %v752_v24  ;;  %v859_v24 = vadd.f32 %v1256_v23, %v1604_v14 }
 0x8b3   :  { %1217 = vtanh.f32 %v758_v26 }
 0x8b9   :  { %v1218_v33 = vpop.eup %1217 }
 0x8ba   :  { %v760_v35 = vmul.f32 %v1218_v33, %v749_v34 }
 0x8bc   :  { %764 = vrot.lane.b32.xlu1 %v760_v35, %s1313_s17 }
 0x92e   :  { %v765_v36 = vpop.permute.xlu1 %764 }
 0x92f   :  { %1129 = vmatmul.msk.f32.vlgmr.msra.gmra.mxu0 %vm167_vm10, %v765_v36  ;;  %1130 = vmatmul.msk.f32.vlgmr.msra.gmra.mxu1 %vm167_vm10, %v765_v36 }
 0x9ac   :  { %v785_v38 = vpop.f32.mrf.mxu0  ;;  %v805_v43 = vpop.f32.mrf.mxu1 }
 0x9ad   :  { %v808_v39 = vadd.f32 %v785_v38, %v761_v37  ;;  %v809_v46 = vadd.f32 %v805_v43, %v762_v44 }
 0x9af   :  { %v1131_v40 = vmul.f32 -1.442695, %v808_v39  ;;  %v1132_v28 = vmul.f32 -1.442695, %v809_v46 }
 0x9b1   :  { %1219 = vpow2.f32 %v1131_v40 }
 0x9b7   :  { %v1220_v41 = vpop.eup %1219 }
 0x9b8   :  { %v816_v42 = vadd.f32 1.0, %v1220_v41 }
 0x9ba   :  { %1221 = vrcp.f32 %v816_v42  ;;  %v829_v49 = vand.u32 2147483648, %v816_v42  ;;  %v827_v20 = vand.u32 2147483647, %v816_v42  ;;  %vm823_vm7 = vweird.f32 %v816_v42 }
 0x9bb   :  { %1223 = vtanh.f32 %v809_v46 }
 0x9bc   :  { %v830_v51 = vor.u32 1.1754944e-38, %v829_v49  ;;  %vm828_vm9 = vcmp.eq.f32.partialorder %v827_v20, 8.507059e+37  ;;  %1225 = vpow2.f32 %v1132_v28 }
 0x9c0   :  { %v1222_v45 = vpop.eup %1221 }
 0x9c1   :  { %v819_v47 = vmul.f32 %v1222_v45, %v816_v42  ;;  %vm824_vm6 = vweird.f32 %v1222_v45  ;;  %v1224_v53 = vpop.eup %1223 }
 0x9c2   :  { %vm825_vm8 = vmor %vm823_vm7, %vm824_vm6  ;;  %v1226_v6 = vpop.eup %1225 }
 0x9c3   :  { %v820_v48 = vsub.f32 1.0, %v819_v47  ;;  %v817_v58 = vadd.f32 1.0, %v1226_v6 }
 0x9c5   :  { %v821_v50 = vmul.f32 %v1222_v45, %v820_v48  ;;  %1227 = vrcp.f32 %v817_v58  ;;  %v844_v11 = vand.u32 2147483648, %v817_v58  ;;  %vm838_vm12 = vweird.f32 %v817_v58 }
 0x9c6   :  { %v842_v19 = vand.u32 2147483647, %v817_v58 }
 0x9c7   :  { %v822_v3 = vadd.f32 %v1222_v45, %v821_v50  ;;  %v845_v1 = vor.u32 1.1754944e-38, %v844_v11 }
 0x9c8   :  { %vm843_vm14 = vcmp.eq.f32.partialorder %v842_v19, 8.507059e+37 }
 0x9c9   :  { %v826_v52 = vsel %vm825_vm8, %v1222_v45, %v822_v3 }
 0x9ca   :  { %v831_v54 = vsel %vm828_vm9, %v830_v51, %v826_v52 }
 0x9cb   :  { %v850_v56 = vmul.f32 %v1224_v53, %v831_v54  ;;  %v1228_v59 = vpop.eup %1227  ;;  %v849_v55 = vmul.f32 %v831_v54, %v758_v26 }
 0x9cc   :  { %v834_v60 = vmul.f32 %v1228_v59, %v817_v58  ;;  %vm839_vm11 = vweird.f32 %v1228_v59 }
 0x9cd   :  { %852 = vrot.lane.b32.xlu2 %v850_v56, %s1313_s17  ;;  %vm840_vm13 = vmor %vm838_vm12, %vm839_vm11 }
 0x9ce   :  { %v835_v61 = vsub.f32 1.0, %v834_v60 }
 0x9d0   :  { %v836_v62 = vmul.f32 %v1228_v59, %v835_v61 }
 0x9d2   :  { %v837_v57 = vadd.f32 %v1228_v59, %v836_v62 }
 0x9d4   :  { %v841_v0 = vsel %vm840_vm13, %v1228_v59, %v837_v57 }
 0x9d5   :  { %v846_v8 = vsel %vm843_vm14, %v845_v1, %v841_v0 }
 0xa27   :  { %v853_v63 = vpop.permute.xlu2 %852 }
 0xa28   :  { %v855_v7 = vadd.f32 %v853_v63, %v849_v55 }
 0xa2a   :  { %1229 = vtanh.f32 %v855_v7 }
 0xa30   :  { %v1230_v2 = vpop.eup %1229 }
 0xa31   :  { %v857_v10 = vmul.f32 %v1230_v2, %v846_v8 }
 0xa33   :  { %861 = vrot.lane.b32.xlu0 %v857_v10, %s1313_s17 }
 0xaa5   :  { %v862_v12 = vpop.permute.xlu0 %861 }
 0xaa6   :  { %1133 = vmatmul.msk.f32.vlgmr.msrb.gmra.mxu2 %vm167_vm10, %v862_v12  ;;  %1134 = vmatmul.msk.f32.vlgmr.msrb.gmra.mxu3 %vm167_vm10, %v862_v12 }
 0xb29   :  { %v882_v4 = vpop.f32.mrf.mxu2  ;;  %v902_v22 = vpop.f32.mrf.mxu3 }
 0xb2a   :  { %v905_v16 = vadd.f32 %v882_v4, %v858_v15  ;;  %v906_v26 = vadd.f32 %v902_v22, %v859_v24 }
 0xb2c   :  { %v1135_v17 = vmul.f32 -1.442695, %v905_v16  ;;  %v1136_v14 = vmul.f32 -1.442695, %v906_v26 }
 0xb2e   :  { %1231 = vpow2.f32 %v1135_v17 }
 0xb34   :  { %v1232_v18 = vpop.eup %1231 }
 0xb35   :  { %v913_v21 = vadd.f32 1.0, %v1232_v18 }
 0xb37   :  { %1233 = vrcp.f32 %v913_v21  ;;  %v926_v30 = vand.u32 2147483648, %v913_v21  ;;  %v924_v5 = vand.u32 2147483647, %v913_v21  ;;  %vm920_vm1 = vweird.f32 %v913_v21 }
 0xb38   :  { %1235 = vtanh.f32 %v906_v26 }
 0xb39   :  { %v927_v33 = vor.u32 1.1754944e-38, %v926_v30  ;;  %vm925_vm3 = vcmp.eq.f32.partialorder %v924_v5, 8.507059e+37  ;;  %1237 = vpow2.f32 %v1136_v14 }
 0xb3d   :  { %v1234_v25 = vpop.eup %1233 }
 0xb3e   :  { %v916_v27 = vmul.f32 %v1234_v25, %v913_v21  ;;  %vm921_vm15 = vweird.f32 %v1234_v25  ;;  %v1236_v35 = vpop.eup %1235 }
 0xb3f   :  { %vm922_vm2 = vmor %vm920_vm1, %vm921_vm15  ;;  %v1238_v38 = vpop.eup %1237  ;;  %vm1050_vm1 = vcmp.ge.s32.totalorder %v1464_v9, 32 }
 0xb40   :  { %v917_v29 = vsub.f32 1.0, %v916_v27  ;;  %v914_v39 = vadd.f32 1.0, %v1238_v38 }
 0xb42   :  { %v918_v31 = vmul.f32 %v1234_v25, %v917_v29  ;;  %1239 = vrcp.f32 %v914_v39  ;;  %v941_v48 = vand.u32 2147483648, %v914_v39  ;;  %vm935_vm5 = vweird.f32 %v914_v39 }
 0xb43   :  { %v939_v49 = vand.u32 2147483647, %v914_v39 }
 0xb44   :  { %v919_v32 = vadd.f32 %v1234_v25, %v918_v31  ;;  %v942_v20 = vor.u32 1.1754944e-38, %v941_v48 }
 0xb45   :  { %vm940_vm6 = vcmp.eq.f32.partialorder %v939_v49, 8.507059e+37 }
 0xb46   :  { %v923_v34 = vsel %vm922_vm2, %v1234_v25, %v919_v32  ;;  %vm1051_vm2 = vcmp.lt.s32.totalorder %v1464_v9, 64 }
 0xb47   :  { %v928_v36 = vsel %vm925_vm3, %v927_v33, %v923_v34  ;;  %vm1052_vm3 = vmand %vm1050_vm1, %vm1051_vm2 }
 0xb48   :  { %v947_v37 = vmul.f32 %v1236_v35, %v928_v36  ;;  %v1240_v40 = vpop.eup %1239  ;;  %v946_v44 = vmul.f32 %v928_v36, %v855_v7 }
 0xb49   :  { %v931_v41 = vmul.f32 %v1240_v40, %v914_v39  ;;  %vm936_vm4 = vweird.f32 %v1240_v40 }
 0xb4a   :  { %949 = vrot.lane.b32.xlu1 %v947_v37, %s1313_s17  ;;  %vm937_vm0 = vmor %vm935_vm5, %vm936_vm4 }
 0xb4b   :  { %v932_v42 = vsub.f32 1.0, %v931_v41 }
 0xb4d   :  { %v933_v43 = vmul.f32 %v1240_v40, %v932_v42 }
 0xb4f   :  { %v934_v47 = vadd.f32 %v1240_v40, %v933_v43 }
 0xb51   :  { %v938_v50 = vsel %vm937_vm0, %v1240_v40, %v934_v47 }
 0xb52   :  { %v943_v51 = vsel %vm940_vm6, %v942_v20, %v938_v50 }
 0xbbc   :  { %v950_v45 = vpop.permute.xlu1 %949 }
 0xbbd   :  { %v952_v46 = vadd.f32 %v950_v45, %v946_v44 }
 0xbbf   :  { %1241 = vtanh.f32 %v952_v46 }
 0xbc5   :  { %v1242_v3 = vpop.eup %1241 }
 0xbc6   :  { %v954_v52 = vmul.f32 %v1242_v3, %v943_v51 }
 0xbc8   :  { %956 = vrot.lane.b32.xlu2 %v954_v52, %s1313_s17 }
 0xbd0   :  { %1058 = vrot.lane.b32.xlu2 %v952_v46, %s1313_s17 }
 0xc22   :  { %v1633_v53 = vpop.permute.xlu2 %956 }
 0xc23   :  { %1137 = vmatmul.msk.f32.vlgmr.msrb.gmra.mxu0 %vm167_vm10, %v1633_v53  ;;  %1138 = vmatmul.msk.f32.vlgmr.msrb.gmra.mxu1 %vm167_vm10, %v1633_v53 }
 0xc2a   :  { %v1059_v5 = vpop.permute.xlu2 %1058 }
 0xca0   :  { %v977_v54 = vpop.f32.mrf.mxu0  ;;  %v997_v59 = vpop.f32.mrf.mxu1 }
 0xca1   :  { %v1000_v56 = vadd.f32 %v1255_v13, %v977_v54  ;;  %v1001_v61 = vadd.f32 %v1256_v23, %v997_v59 }
 0xca3   :  { %v1139_v28 = vmul.f32 -1.442695, %v1000_v56  ;;  %v1140_v10 = vmul.f32 -1.442695, %v1001_v61 }
 0xca5   :  { %1243 = vpow2.f32 %v1139_v28 }
 0xcab   :  { %v1244_v6 = vpop.eup %1243 }
 0xcac   :  { %v1008_v58 = vadd.f32 1.0, %v1244_v6 }
 0xcae   :  { %1245 = vrcp.f32 %v1008_v58  ;;  %v1021_v63 = vand.u32 2147483648, %v1008_v58  ;;  %v1019_v57 = vand.u32 2147483647, %v1008_v58  ;;  %vm1015_vm8 = vweird.f32 %v1008_v58 }
 0xcaf   :  { %1247 = vtanh.f32 %v1001_v61 }
 0xcb0   :  { %v1022_v19 = vor.u32 1.1754944e-38, %v1021_v63  ;;  %vm1020_vm11 = vcmp.eq.f32.partialorder %v1019_v57, 8.507059e+37  ;;  %1249 = vpow2.f32 %v1140_v10 }
 0xcb4   :  { %v1246_v60 = vpop.eup %1245 }
 0xcb5   :  { %v1011_v62 = vmul.f32 %v1246_v60, %v1008_v58  ;;  %vm1016_vm7 = vweird.f32 %v1246_v60  ;;  %v1248_v1 = vpop.eup %1247 }
 0xcb6   :  { %vm1017_vm9 = vmor %vm1015_vm8, %vm1016_vm7  ;;  %v1250_v12 = vpop.eup %1249 }
 0xcb7   :  { %v1012_v55 = vsub.f32 1.0, %v1011_v62  ;;  %v1009_v13 = vadd.f32 1.0, %v1250_v12 }
 0xcb9   :  { %v1013_v7 = vmul.f32 %v1246_v60, %v1012_v55  ;;  %1251 = vrcp.f32 %v1009_v13  ;;  %v1036_v24 = vand.u32 2147483648, %v1009_v13  ;;  %vm1030_vm13 = vweird.f32 %v1009_v13 }
 0xcba   :  { %v1034_v25 = vand.u32 2147483647, %v1009_v13 }
 0xcbb   :  { %v1014_v11 = vadd.f32 %v1246_v60, %v1013_v7  ;;  %v1037_v27 = vor.u32 1.1754944e-38, %v1036_v24 }
 0xcbc   :  { %vm1035_vm15 = vcmp.eq.f32.partialorder %v1034_v25, 8.507059e+37 }
 0xcbd   :  { %v1018_v0 = vsel %vm1017_vm9, %v1246_v60, %v1014_v11 }
 0xcbe   :  { %v1023_v2 = vsel %vm1020_vm11, %v1022_v19, %v1018_v0 }
 0xcbf   :  { %v1042_v8 = vmul.f32 %v1248_v1, %v1023_v2  ;;  %v1252_v15 = vpop.eup %1251  ;;  %v1041_v18 = vmul.f32 %v1023_v2, %v952_v46 }
 0xcc0   :  { %v1026_v4 = vmul.f32 %v1252_v15, %v1009_v13  ;;  %vm1031_vm12 = vweird.f32 %v1252_v15 }
 0xcc1   :  { %1044 = vrot.lane.b32.xlu0 %v1042_v8, %s1313_s17  ;;  %vm1032_vm14 = vmor %vm1030_vm13, %vm1031_vm12 }
 0xcc2   :  { %v1027_v16 = vsub.f32 1.0, %v1026_v4 }
 0xcc4   :  { %v1028_v17 = vmul.f32 %v1252_v15, %v1027_v16 }
 0xcc6   :  { %v1029_v23 = vadd.f32 %v1252_v15, %v1028_v17 }
 0xcc8   :  { %v1033_v26 = vsel %vm1032_vm14, %v1252_v15, %v1029_v23 }
 0xcc9   :  { %v1038_v30 = vsel %vm1035_vm15, %v1037_v27, %v1033_v26 }
 0xd33   :  { %v1045_v21 = vpop.permute.xlu0 %1044 }
 0xd34   :  { %v1047_v22 = vadd.f32 %v1045_v21, %v1041_v18 }
 0xd36   :  { %1253 = vtanh.f32 %v1047_v22  ;;  %1054 = vrot.lane.b32.xlu1 %v1047_v22, %s1313_s17 }
 0xd3c   :  { %v1254_v29 = vpop.eup %1253 }
 0xd3d   :  { %v1049_v31 = vmul.f32 %v1254_v29, %v1038_v30 }
 0xd3f   :  { %1063 = vrot.lane.b32.xlu0 %v1049_v31, %s1313_s17 }
 0xda8   :  { %v1055_v32 = vpop.permute.xlu1 %1054 }
 0xda9   :  { %v1061_v33 = vsel %vm1052_vm3, %v1055_v32, %v1059_v5 }
 0xdaa   :  { %1069 = vrot.lane.b32.xlu1 %v1061_v33, %s1313_s17 }
 0xdb1   :  { %v1064_v34 = vpop.permute.xlu0 %1063 }
 0xdb2   :  { %v1067_v35 = vsel %vm1052_vm3, %v1064_v34, %v1633_v53 }
 0xe1c   :  { %v1070_v36 = vpop.permute.xlu1 %1069 }
 0xe1d   :  { %v1072_v9 = vsel %vm167_vm10, %v1067_v35, %v1070_v36 }
 0xe1e   :  { %1073 = vst [vmem:[#allocation5] sm:$0xff] %v1072_v9 }
 0xe1f   :  { %1084 = dma.vmem_to_hbm [thread:$0]  %s1080_s4, 128, %s1082_s7, [#allocation4]  }
 0xe20   :  { %1307 = dma.done.wait [#allocation4], 128  }
 0xe21   :  { %1308 = vsyncadd [#allocation4], 4294967168 }
 0xe22   :  { %1089 = vsyncpa [#allocation3], 1 }
 0xe23   :  { %1090 = vsyncpa [#allocation4], 1 }

</bundles_post_ra>
